<compile_context>
chip_gen: v7x
topology: tpu7x:2x2x1
jax: 0.10.0
libtpu: 0.0.40
codegen_flags: <defaults>
</compile_context>

<pallas_src>
import math
import functools

import jax
import jax.numpy as jnp
from jax import lax
from jax.experimental import pallas as pl
from jax.experimental.pallas import tpu as pltpu


# ---------------------------- GRU recurrence kernel ----------------------------
def gru_kernel(x_ref, wx_ref, b_ref, uzr_ref, uh_ref, len_ref, out_ref, h_ref, xp_ref):
    # x_ref/out_ref: (Tc, Bc, H)   wx_ref: (H, 3H) bf16   b_ref: (1, 3H) f32
    # uzr_ref: (H, 2H) bf16        uh_ref: (H, H) bf16    len_ref: (Bc, 1) int32
    # h_ref: (Bc, H) f32 scratch (carried across time chunks)
    # xp_ref: (Tc, Bc, 3H) f32 scratch (hoisted input projection for this chunk)
    Tc, Bc, H = x_ref.shape
    t_chunk = pl.program_id(1)

    @pl.when(t_chunk == 0)
    def _():
        h_ref[...] = jnp.zeros_like(h_ref)

    # Hoisted input projection for the whole time chunk (bias folded in):
    #   (Tc*Bc, H) @ (H, 3H) in bf16, f32 accumulation — full-occupancy MXU work.
    x2d = x_ref[...].reshape(Tc * Bc, H).astype(jnp.bfloat16)
    xp = jnp.dot(x2d, wx_ref[...], preferred_element_type=jnp.float32) + b_ref[...]
    xp_ref[...] = xp.reshape(Tc, Bc, 3 * H)

    lengths = len_ref[...]                 # (Bc, 1) int32
    t0 = t_chunk * Tc

    def step(t, carry):
        h = h_ref[...]                                                   # (Bc, H) f32
        xg = xp_ref[t]                                                   # (Bc, 3H) = [xz | xr | xh]
        hzr = jnp.dot(h.astype(jnp.bfloat16), uzr_ref[...],
                      preferred_element_type=jnp.float32)                # (Bc, 2H) = [hz | hr]
        z = jax.nn.sigmoid(xg[:, 0:H] + hzr[:, 0:H])
        r = jax.nn.sigmoid(xg[:, H:2 * H] + hzr[:, H:2 * H])
        hh = jnp.dot((r * h).astype(jnp.bfloat16), uh_ref[...],
                     preferred_element_type=jnp.float32)                 # (Bc, H)
        h_cand = jnp.tanh(xg[:, 2 * H:3 * H] + hh)
        h_new = (1.0 - z) * h + z * h_cand
        h_ref[...] = h_new
        # pack_padded_sequence: positions >= length are dropped -> zero in padded output
        mask = (lengths > (t0 + t)).astype(jnp.float32)                  # (Bc, 1)
        out_ref[t] = h_new * mask
        return carry

    lax.fori_loop(0, Tc, step, 0, unroll=True)


@functools.partial(jax.jit, static_argnames=("block_t", "block_b"))
def gru_forward(params, x_bth, lengths, *, block_t=8, block_b=8):
    """x_bth: padded batch-first (B, T, I) with padding zero-filled; lengths: (B,) int."""
    B, T, I = x_bth.shape
    H = params["uh"].shape[0]
    assert I == H, "module's W @ x_t form requires input_size == hidden_size"
    bt = min(block_t, T)
    bb = min(block_b, B)
    assert T % bt == 0 and B % bb == 0

    x_tbh = jnp.transpose(x_bth, (1, 0, 2))          # mirrors x_unpacked.permute(1, 0, 2)
    len_col = lengths.astype(jnp.int32).reshape(B, 1)

    grid = (B // bb, T // bt)                        # (parallel batch blocks, serial time chunks)
    out_tbh = pl.pallas_call(
        gru_kernel,
        out_shape=jax.ShapeDtypeStruct((T, B, H), jnp.float32),
        grid_spec=pltpu.PrefetchScalarGridSpec(
            num_scalar_prefetch=0,
            grid=grid,
            in_specs=[
                pl.BlockSpec((bt, bb, H), lambda b, t: (t, b, 0)),   # x (time-major)
                pl.BlockSpec((H, 3 * H), lambda b, t: (0, 0)),       # [Wz.T | Wr.T | Wh.T] bf16
                pl.BlockSpec((1, 3 * H), lambda b, t: (0, 0)),       # [bz | br | bh]
                pl.BlockSpec((H, 2 * H), lambda b, t: (0, 0)),       # [Uz.T | Ur.T] bf16
                pl.BlockSpec((H, H), lambda b, t: (0, 0)),           # Uh.T bf16
                pl.BlockSpec((bb, 1), lambda b, t: (b, 0)),          # lengths
            ],
            out_specs=pl.BlockSpec((bt, bb, H), lambda b, t: (t, b, 0)),
            scratch_shapes=[
                pltpu.VMEM((bb, H), jnp.float32),          # carried hidden state
                pltpu.VMEM((bt, bb, 3 * H), jnp.float32),  # per-chunk input projection
            ],
        ),
        compiler_params=pltpu.CompilerParams(
            dimension_semantics=("parallel", "arbitrary"),
            vmem_limit_bytes=64 * 1024 * 1024,
        ),
    )(x_tbh, params["wx"], params["b"], params["uzr"], params["uh"], len_col)

    # back to batch-first padded output; rows with t >= lengths[b] are zero
    return jnp.transpose(out_tbh, (1, 0, 2))


# ---------------------------- parameters (torch-faithful init) ----------------------------
def init_params(key, input_size, hidden_size):
    stdv = 1.0 / math.sqrt(hidden_size)
    ks = jax.random.split(key, 6)

    def u(k, shape):
        return jax.random.uniform(k, shape, jnp.float32, -stdv, stdv)

    raw = {
        "W_z": u(ks[0], (input_size, hidden_size)),
        "U_z": u(ks[1], (hidden_size, hidden_size)),
        "b_z": jnp.zeros((hidden_size,), jnp.float32),
        "W_r": u(ks[2], (input_size, hidden_size)),
        "U_r": u(ks[3], (hidden_size, hidden_size)),
        "b_r": jnp.zeros((hidden_size,), jnp.float32),
        "W_h": u(ks[4], (input_size, hidden_size)),
        "U_h": u(ks[5], (hidden_size, hidden_size)),
        "b_h": jnp.zeros((hidden_size,), jnp.float32),
    }
    H = hidden_size
    # Prepared once: x @ W.T / h @ U.T form, gate-concatenated, bf16 for the MXU.
    prepared = {
        "wx": jnp.concatenate([raw["W_z"].T, raw["W_r"].T, raw["W_h"].T], axis=1).astype(jnp.bfloat16),
        "b": jnp.concatenate([raw["b_z"], raw["b_r"], raw["b_h"]]).reshape(1, 3 * H).astype(jnp.float32),
        "uzr": jnp.concatenate([raw["U_z"].T, raw["U_r"].T], axis=1).astype(jnp.bfloat16),
        "uh": raw["U_h"].T.astype(jnp.bfloat16),
    }
    return raw, prepared


# ---------------------------- pure-JAX f32 reference (torch math verbatim) ----------------------------
def gru_reference(raw, x_bth, lengths):
    B, T, _ = x_bth.shape
    H = raw["U_z"].shape[0]
    x_tbh = jnp.transpose(x_bth, (1, 0, 2))
    h0 = jnp.zeros((B, H), jnp.float32)

    def step(h, x_t):
        z = jax.nn.sigmoid(x_t @ raw["W_z"].T + h @ raw["U_z"].T + raw["b_z"])
        r = jax.nn.sigmoid(x_t @ raw["W_r"].T + h @ raw["U_r"].T + raw["b_r"])
        h_t = jnp.tanh(x_t @ raw["W_h"].T + (r * h) @ raw["U_h"].T + raw["b_h"])
        h_new = (1.0 - z) * h + z * h_t
        return h_new, h_new

    _, hs = lax.scan(step, h0, x_tbh)                       # (T, B, H)
    out = jnp.transpose(hs, (1, 0, 2))
    mask = (jnp.arange(T)[None, :] < lengths[:, None]).astype(jnp.float32)
    return out * mask[..., None]


if __name__ == "__main__":
    key = jax.random.PRNGKey(0)
    k_par, k_x = jax.random.split(key)

    B, T, H = 8, 16, 128                                    # B fills sublanes, H fills lanes
    raw, prepared = init_params(k_par, input_size=H, hidden_size=H)

    # TODO(synk): PackedSequence itself (pack/pad bookkeeping) has no Pallas equivalent;
    # it is represented here as padded batch-first data + descending lengths, zero padding.
    lengths = jnp.array([16, 14, 12, 10, 8, 6, 4, 2], dtype=jnp.int32)
    x = jax.random.normal(k_x, (B, T, H), jnp.float32)
    valid = (jnp.arange(T)[None, :] < lengths[:, None]).astype(jnp.float32)
    x = x * valid[..., None]                                # pad_packed_sequence zero-fills padding

    out = gru_forward(prepared, x, lengths)
    jax.block_until_ready(out)

    ref = gru_reference(raw, x, lengths)
    assert out.shape == (B, T, H)
    err = float(jnp.max(jnp.abs(out - ref)))
    assert err < 3e-2, f"max abs err vs f32 reference = {err}"
    # padded positions must be exactly zero (packed-sequence contract)
    assert float(jnp.max(jnp.abs(out * (1.0 - valid)[..., None]))) == 0.0

    print("KERNEL_OK")
</pallas_src>

<mosaic_0001>
module attributes {stable_mosaic.version = 11 : i64} {
  func.func @gru_kernel(%arg0: i32, %arg1: i32, %arg2: memref<8x8x128xf32, #tpu.memory_space<vmem>>, %arg3: memref<128x384xbf16, #tpu.memory_space<vmem>>, %arg4: memref<1x384xf32, #tpu.memory_space<vmem>>, %arg5: memref<128x256xbf16, #tpu.memory_space<vmem>>, %arg6: memref<128x128xbf16, #tpu.memory_space<vmem>>, %arg7: memref<8x1xi32, #tpu.memory_space<vmem>>, %arg8: memref<8x8x128xf32, #tpu.memory_space<vmem>>, %arg9: memref<8x128xf32, #tpu.memory_space<vmem>>, %arg10: memref<8x8x384xf32, #tpu.memory_space<vmem>>) attributes {dimension_semantics = [#tpu.dimension_semantics<parallel>, #tpu.dimension_semantics<arbitrary>], iteration_bounds = array<i64: 1, 2>, scalar_prefetch = 0 : i64, scratch_operands = 2 : i64, tpu.core_type = #tpu.core_type<tc>, window_params = [{transform_indices = @transform_0, window_bounds = array<i64: 8, 8, 128>}, {pipeline_mode = #tpu.pipeline_mode<synchronous>, transform_indices = @transform_1, window_bounds = array<i64: 128, 384>}, {pipeline_mode = #tpu.pipeline_mode<synchronous>, transform_indices = @transform_2, window_bounds = array<i64: 1, 384>}, {pipeline_mode = #tpu.pipeline_mode<synchronous>, transform_indices = @transform_3, window_bounds = array<i64: 128, 256>}, {pipeline_mode = #tpu.pipeline_mode<synchronous>, transform_indices = @transform_4, window_bounds = array<i64: 128, 128>}, {transform_indices = @transform_5, window_bounds = array<i64: 8, 1>}, {transform_indices = @transform_6, window_bounds = array<i64: 8, 8, 128>}]} {
    %c0_i32 = arith.constant 0 : i32
    %0 = arith.cmpi eq, %arg1, %c0_i32 : i32
    %1 = arith.extui %0 : i1 to i32
    %c0_i32_0 = arith.constant 0 : i32
    %2 = arith.cmpi ne, %1, %c0_i32_0 : i32
    scf.if %2 {
      %cst_150 = arith.constant 0.000000e+00 : f32
      %391 = vector.broadcast %cst_150 : f32 to vector<8x128xf32>
      %c0_151 = arith.constant 0 : index
      %c0_152 = arith.constant 0 : index
      %392 = vector.load %arg9[%c0_151, %c0_152] : memref<8x128xf32, #tpu.memory_space<vmem>>, vector<8x128xf32>
      tpu.vector_store %arg9[%c0_151, %c0_152], %391 {strides = array<i32>} : memref<8x128xf32, #tpu.memory_space<vmem>>, vector<8x128xf32>,
    } else {
    }
    %c0 = arith.constant 0 : index
    %c0_1 = arith.constant 0 : index
    %c0_2 = arith.constant 0 : index
    %3 = vector.load %arg2[%c0, %c0_1, %c0_2] : memref<8x8x128xf32, #tpu.memory_space<vmem>>, vector<8x8x128xf32>
    %4 = vector.shape_cast %3 : vector<8x8x128xf32> to vector<64x128xf32>
    %5 = arith.truncf %4 : vector<64x128xf32> to vector<64x128xbf16>
    %c0_3 = arith.constant 0 : index
    %c0_4 = arith.constant 0 : index
    %6 = vector.load %arg3[%c0_3, %c0_4] : memref<128x384xbf16, #tpu.memory_space<vmem>>, vector<128x384xbf16>
    %cst = arith.constant dense<0.000000e+00> : vector<64x384xf32>
    %7 = tpu.matmul %5, %6, %cst {dimension_numbers = #tpu.dot_dimension_numbers<[1], [0], [0], [1], [0, 0, 1, 1], [], []>} : vector<64x128xbf16>, vector<128x384xbf16>, vector<64x384xf32> -> vector<64x384xf32>
    %c0_5 = arith.constant 0 : index
    %c0_6 = arith.constant 0 : index
    %8 = vector.load %arg4[%c0_5, %c0_6] : memref<1x384xf32, #tpu.memory_space<vmem>>, vector<1x384xf32>
    %9 = vector.broadcast %8 : vector<1x384xf32> to vector<64x384xf32>
    %10 = arith.addf %7, %9 : vector<64x384xf32>
    %11 = vector.shape_cast %10 : vector<64x384xf32> to vector<8x8x384xf32>
    %c0_7 = arith.constant 0 : index
    %c0_8 = arith.constant 0 : index
    %c0_9 = arith.constant 0 : index
    %12 = vector.load %arg10[%c0_7, %c0_8, %c0_9] : memref<8x8x384xf32, #tpu.memory_space<vmem>>, vector<8x8x384xf32>
    tpu.vector_store %arg10[%c0_7, %c0_8, %c0_9], %11 {strides = array<i32>} : memref<8x8x384xf32, #tpu.memory_space<vmem>>, vector<8x8x384xf32>,
    %c0_10 = arith.constant 0 : index
    %c0_11 = arith.constant 0 : index
    %13 = vector.load %arg7[%c0_10, %c0_11] : memref<8x1xi32, #tpu.memory_space<vmem>>, vector<8x1xi32>
    %c8_i32 = arith.constant 8 : i32
    %14 = arith.muli %arg1, %c8_i32 : i32
    %c0_i32_12 = arith.constant 0 : i32
    %c0_13 = arith.constant 0 : index
    %c0_14 = arith.constant 0 : index
    %15 = vector.load %arg9[%c0_13, %c0_14] : memref<8x128xf32, #tpu.memory_space<vmem>>, vector<8x128xf32>
    %16 = arith.index_cast %c0_i32_12 : i32 to index
    %c0_15 = arith.constant 0 : index
    %c0_16 = arith.constant 0 : index
    %17 = vector.load %arg10[%16, %c0_15, %c0_16] : memref<8x8x384xf32, #tpu.memory_space<vmem>>, vector<1x8x384xf32>
    %18 = vector.shape_cast %17 : vector<1x8x384xf32> to vector<8x384xf32>
    %19 = arith.truncf %15 : vector<8x128xf32> to vector<8x128xbf16>
    %c0_17 = arith.constant 0 : index
    %c0_18 = arith.constant 0 : index
    %20 = vector.load %arg5[%c0_17, %c0_18] : memref<128x256xbf16, #tpu.memory_space<vmem>>, vector<128x256xbf16>
    %cst_19 = arith.constant dense<0.000000e+00> : vector<8x256xf32>
    %21 = tpu.matmul %19, %20, %cst_19 {dimension_numbers = #tpu.dot_dimension_numbers<[1], [0], [0], [1], [0, 0, 1, 1], [], []>} : vector<8x128xbf16>, vector<128x256xbf16>, vector<8x256xf32> -> vector<8x256xf32>
    %22 = vector.extract_strided_slice %18 {offsets = [0, 0], sizes = [8, 128], strides = [1, 1]} : vector<8x384xf32> to vector<8x128xf32>
    %23 = vector.extract_strided_slice %21 {offsets = [0, 0], sizes = [8, 128], strides = [1, 1]} : vector<8x256xf32> to vector<8x128xf32>
    %24 = arith.addf %22, %23 : vector<8x128xf32>
    %25 = arith.negf %24 : vector<8x128xf32>
    %26 = math.exp %25 : vector<8x128xf32>
    %cst_20 = arith.constant 1.000000e+00 : f32
    %27 = vector.broadcast %cst_20 : f32 to vector<8x128xf32>
    %28 = arith.addf %27, %26 : vector<8x128xf32>
    %29 = arith.divf %27, %28 : vector<8x128xf32>
    %30 = vector.extract_strided_slice %18 {offsets = [0, 128], sizes = [8, 128], strides = [1, 1]} : vector<8x384xf32> to vector<8x128xf32>
    %31 = vector.extract_strided_slice %21 {offsets = [0, 128], sizes = [8, 128], strides = [1, 1]} : vector<8x256xf32> to vector<8x128xf32>
    %32 = arith.addf %30, %31 : vector<8x128xf32>
    %33 = arith.negf %32 : vector<8x128xf32>
    %34 = math.exp %33 : vector<8x128xf32>
    %cst_21 = arith.constant 1.000000e+00 : f32
    %35 = vector.broadcast %cst_21 : f32 to vector<8x128xf32>
    %36 = arith.addf %35, %34 : vector<8x128xf32>
    %37 = arith.divf %35, %36 : vector<8x128xf32>
    %38 = arith.mulf %37, %15 : vector<8x128xf32>
    %39 = arith.truncf %38 : vector<8x128xf32> to vector<8x128xbf16>
    %c0_22 = arith.constant 0 : index
    %c0_23 = arith.constant 0 : index
    %40 = vector.load %arg6[%c0_22, %c0_23] : memref<128x128xbf16, #tpu.memory_space<vmem>>, vector<128x128xbf16>
    %cst_24 = arith.constant dense<0.000000e+00> : vector<8x128xf32>
    %41 = tpu.matmul %39, %40, %cst_24 {dimension_numbers = #tpu.dot_dimension_numbers<[1], [0], [0], [1], [0, 0, 1, 1], [], []>} : vector<8x128xbf16>, vector<128x128xbf16>, vector<8x128xf32> -> vector<8x128xf32>
    %42 = vector.extract_strided_slice %18 {offsets = [0, 256], sizes = [8, 128], strides = [1, 1]} : vector<8x384xf32> to vector<8x128xf32>
    %43 = arith.addf %42, %41 : vector<8x128xf32>
    %44 = math.tanh %43 : vector<8x128xf32>
    %cst_25 = arith.constant 1.000000e+00 : f32
    %45 = vector.broadcast %cst_25 : f32 to vector<8x128xf32>
    %46 = arith.subf %45, %29 : vector<8x128xf32>
    %47 = arith.mulf %46, %15 : vector<8x128xf32>
    %48 = arith.mulf %29, %44 : vector<8x128xf32>
    %49 = arith.addf %47, %48 : vector<8x128xf32>
    %c0_26 = arith.constant 0 : index
    %c0_27 = arith.constant 0 : index
    %50 = vector.load %arg9[%c0_26, %c0_27] : memref<8x128xf32, #tpu.memory_space<vmem>>, vector<8x128xf32>
    tpu.vector_store %arg9[%c0_26, %c0_27], %49 {strides = array<i32>} : memref<8x128xf32, #tpu.memory_space<vmem>>, vector<8x128xf32>,
    %51 = arith.addi %14, %c0_i32_12 : i32
    %52 = vector.broadcast %51 : i32 to vector<8x1xi32>
    %53 = arith.cmpi sgt, %13, %52 : vector<8x1xi32>
    %54 = arith.extui %53 : vector<8x1xi1> to vector<8x1xi32>
    %55 = arith.sitofp %54 : vector<8x1xi32> to vector<8x1xf32>
    %56 = vector.broadcast %55 : vector<8x1xf32> to vector<8x128xf32>
    %57 = arith.mulf %49, %56 : vector<8x128xf32>
    %58 = arith.index_cast %c0_i32_12 : i32 to index
    %c0_28 = arith.constant 0 : index
    %c0_29 = arith.constant 0 : index
    %59 = vector.load %arg8[%58, %c0_28, %c0_29] : memref<8x8x128xf32, #tpu.memory_space<vmem>>, vector<1x8x128xf32>
    %60 = vector.shape_cast %59 : vector<1x8x128xf32> to vector<8x128xf32>
    %61 = vector.shape_cast %57 : vector<8x128xf32> to vector<1x8x128xf32>
    tpu.vector_store %arg8[%58, %c0_28, %c0_29], %61 {strides = array<i32>} : memref<8x8x128xf32, #tpu.memory_space<vmem>>, vector<1x8x128xf32>,
    %c1_i32 = arith.constant 1 : i32
    %c0_30 = arith.constant 0 : index
    %c0_31 = arith.constant 0 : index
    %62 = vector.load %arg9[%c0_30, %c0_31] : memref<8x128xf32, #tpu.memory_space<vmem>>, vector<8x128xf32>
    %63 = arith.index_cast %c1_i32 : i32 to index
    %c0_32 = arith.constant 0 : index
    %c0_33 = arith.constant 0 : index
    %64 = vector.load %arg10[%63, %c0_32, %c0_33] : memref<8x8x384xf32, #tpu.memory_space<vmem>>, vector<1x8x384xf32>
    %65 = vector.shape_cast %64 : vector<1x8x384xf32> to vector<8x384xf32>
    %66 = arith.truncf %62 : vector<8x128xf32> to vector<8x128xbf16>
    %c0_34 = arith.constant 0 : index
    %c0_35 = arith.constant 0 : index
    %67 = vector.load %arg5[%c0_34, %c0_35] : memref<128x256xbf16, #tpu.memory_space<vmem>>, vector<128x256xbf16>
    %cst_36 = arith.constant dense<0.000000e+00> : vector<8x256xf32>
    %68 = tpu.matmul %66, %67, %cst_36 {dimension_numbers = #tpu.dot_dimension_numbers<[1], [0], [0], [1], [0, 0, 1, 1], [], []>} : vector<8x128xbf16>, vector<128x256xbf16>, vector<8x256xf32> -> vector<8x256xf32>
    %69 = vector.extract_strided_slice %65 {offsets = [0, 0], sizes = [8, 128], strides = [1, 1]} : vector<8x384xf32> to vector<8x128xf32>
    %70 = vector.extract_strided_slice %68 {offsets = [0, 0], sizes = [8, 128], strides = [1, 1]} : vector<8x256xf32> to vector<8x128xf32>
    %71 = arith.addf %69, %70 : vector<8x128xf32>
    %72 = arith.negf %71 : vector<8x128xf32>
    %73 = math.exp %72 : vector<8x128xf32>
    %cst_37 = arith.constant 1.000000e+00 : f32
    %74 = vector.broadcast %cst_37 : f32 to vector<8x128xf32>
    %75 = arith.addf %74, %73 : vector<8x128xf32>
    %76 = arith.divf %74, %75 : vector<8x128xf32>
    %77 = vector.extract_strided_slice %65 {offsets = [0, 128], sizes = [8, 128], strides = [1, 1]} : vector<8x384xf32> to vector<8x128xf32>
    %78 = vector.extract_strided_slice %68 {offsets = [0, 128], sizes = [8, 128], strides = [1, 1]} : vector<8x256xf32> to vector<8x128xf32>
    %79 = arith.addf %77, %78 : vector<8x128xf32>
    %80 = arith.negf %79 : vector<8x128xf32>
    %81 = math.exp %80 : vector<8x128xf32>
    %cst_38 = arith.constant 1.000000e+00 : f32
    %82 = vector.broadcast %cst_38 : f32 to vector<8x128xf32>
    %83 = arith.addf %82, %81 : vector<8x128xf32>
    %84 = arith.divf %82, %83 : vector<8x128xf32>
    %85 = arith.mulf %84, %62 : vector<8x128xf32>
    %86 = arith.truncf %85 : vector<8x128xf32> to vector<8x128xbf16>
    %c0_39 = arith.constant 0 : index
    %c0_40 = arith.constant 0 : index
    %87 = vector.load %arg6[%c0_39, %c0_40] : memref<128x128xbf16, #tpu.memory_space<vmem>>, vector<128x128xbf16>
    %cst_41 = arith.constant dense<0.000000e+00> : vector<8x128xf32>
    %88 = tpu.matmul %86, %87, %cst_41 {dimension_numbers = #tpu.dot_dimension_numbers<[1], [0], [0], [1], [0, 0, 1, 1], [], []>} : vector<8x128xbf16>, vector<128x128xbf16>, vector<8x128xf32> -> vector<8x128xf32>
    %89 = vector.extract_strided_slice %65 {offsets = [0, 256], sizes = [8, 128], strides = [1, 1]} : vector<8x384xf32> to vector<8x128xf32>
    %90 = arith.addf %89, %88 : vector<8x128xf32>
    %91 = math.tanh %90 : vector<8x128xf32>
    %cst_42 = arith.constant 1.000000e+00 : f32
    %92 = vector.broadcast %cst_42 : f32 to vector<8x128xf32>
    %93 = arith.subf %92, %76 : vector<8x128xf32>
    %94 = arith.mulf %93, %62 : vector<8x128xf32>
    %95 = arith.mulf %76, %91 : vector<8x128xf32>
    %96 = arith.addf %94, %95 : vector<8x128xf32>
    %c0_43 = arith.constant 0 : index
    %c0_44 = arith.constant 0 : index
    %97 = vector.load %arg9[%c0_43, %c0_44] : memref<8x128xf32, #tpu.memory_space<vmem>>, vector<8x128xf32>
    tpu.vector_store %arg9[%c0_43, %c0_44], %96 {strides = array<i32>} : memref<8x128xf32, #tpu.memory_space<vmem>>, vector<8x128xf32>,
    %98 = arith.addi %14, %c1_i32 : i32
    %99 = vector.broadcast %98 : i32 to vector<8x1xi32>
    %100 = arith.cmpi sgt, %13, %99 : vector<8x1xi32>
    %101 = arith.extui %100 : vector<8x1xi1> to vector<8x1xi32>
    %102 = arith.sitofp %101 : vector<8x1xi32> to vector<8x1xf32>
    %103 = vector.broadcast %102 : vector<8x1xf32> to vector<8x128xf32>
    %104 = arith.mulf %96, %103 : vector<8x128xf32>
    %105 = arith.index_cast %c1_i32 : i32 to index
    %c0_45 = arith.constant 0 : index
    %c0_46 = arith.constant 0 : index
    %106 = vector.load %arg8[%105, %c0_45, %c0_46] : memref<8x8x128xf32, #tpu.memory_space<vmem>>, vector<1x8x128xf32>
    %107 = vector.shape_cast %106 : vector<1x8x128xf32> to vector<8x128xf32>
    %108 = vector.shape_cast %104 : vector<8x128xf32> to vector<1x8x128xf32>
    tpu.vector_store %arg8[%105, %c0_45, %c0_46], %108 {strides = array<i32>} : memref<8x8x128xf32, #tpu.memory_space<vmem>>, vector<1x8x128xf32>,
    %c2_i32 = arith.constant 2 : i32
    %c0_47 = arith.constant 0 : index
    %c0_48 = arith.constant 0 : index
    %109 = vector.load %arg9[%c0_47, %c0_48] : memref<8x128xf32, #tpu.memory_space<vmem>>, vector<8x128xf32>
    %110 = arith.index_cast %c2_i32 : i32 to index
    %c0_49 = arith.constant 0 : index
    %c0_50 = arith.constant 0 : index
    %111 = vector.load %arg10[%110, %c0_49, %c0_50] : memref<8x8x384xf32, #tpu.memory_space<vmem>>, vector<1x8x384xf32>
    %112 = vector.shape_cast %111 : vector<1x8x384xf32> to vector<8x384xf32>
    %113 = arith.truncf %109 : vector<8x128xf32> to vector<8x128xbf16>
    %c0_51 = arith.constant 0 : index
    %c0_52 = arith.constant 0 : index
    %114 = vector.load %arg5[%c0_51, %c0_52] : memref<128x256xbf16, #tpu.memory_space<vmem>>, vector<128x256xbf16>
    %cst_53 = arith.constant dense<0.000000e+00> : vector<8x256xf32>
    %115 = tpu.matmul %113, %114, %cst_53 {dimension_numbers = #tpu.dot_dimension_numbers<[1], [0], [0], [1], [0, 0, 1, 1], [], []>} : vector<8x128xbf16>, vector<128x256xbf16>, vector<8x256xf32> -> vector<8x256xf32>
    %116 = vector.extract_strided_slice %112 {offsets = [0, 0], sizes = [8, 128], strides = [1, 1]} : vector<8x384xf32> to vector<8x128xf32>
    %117 = vector.extract_strided_slice %115 {offsets = [0, 0], sizes = [8, 128], strides = [1, 1]} : vector<8x256xf32> to vector<8x128xf32>
    %118 = arith.addf %116, %117 : vector<8x128xf32>
    %119 = arith.negf %118 : vector<8x128xf32>
    %120 = math.exp %119 : vector<8x128xf32>
    %cst_54 = arith.constant 1.000000e+00 : f32
    %121 = vector.broadcast %cst_54 : f32 to vector<8x128xf32>
    %122 = arith.addf %121, %120 : vector<8x128xf32>
    %123 = arith.divf %121, %122 : vector<8x128xf32>
    %124 = vector.extract_strided_slice %112 {offsets = [0, 128], sizes = [8, 128], strides = [1, 1]} : vector<8x384xf32> to vector<8x128xf32>
    %125 = vector.extract_strided_slice %115 {offsets = [0, 128], sizes = [8, 128], strides = [1, 1]} : vector<8x256xf32> to vector<8x128xf32>
    %126 = arith.addf %124, %125 : vector<8x128xf32>
    %127 = arith.negf %126 : vector<8x128xf32>
    %128 = math.exp %127 : vector<8x128xf32>
    %cst_55 = arith.constant 1.000000e+00 : f32
    %129 = vector.broadcast %cst_55 : f32 to vector<8x128xf32>
    %130 = arith.addf %129, %128 : vector<8x128xf32>
    %131 = arith.divf %129, %130 : vector<8x128xf32>
    %132 = arith.mulf %131, %109 : vector<8x128xf32>
    %133 = arith.truncf %132 : vector<8x128xf32> to vector<8x128xbf16>
    %c0_56 = arith.constant 0 : index
    %c0_57 = arith.constant 0 : index
    %134 = vector.load %arg6[%c0_56, %c0_57] : memref<128x128xbf16, #tpu.memory_space<vmem>>, vector<128x128xbf16>
    %cst_58 = arith.constant dense<0.000000e+00> : vector<8x128xf32>
    %135 = tpu.matmul %133, %134, %cst_58 {dimension_numbers = #tpu.dot_dimension_numbers<[1], [0], [0], [1], [0, 0, 1, 1], [], []>} : vector<8x128xbf16>, vector<128x128xbf16>, vector<8x128xf32> -> vector<8x128xf32>
    %136 = vector.extract_strided_slice %112 {offsets = [0, 256], sizes = [8, 128], strides = [1, 1]} : vector<8x384xf32> to vector<8x128xf32>
    %137 = arith.addf %136, %135 : vector<8x128xf32>
    %138 = math.tanh %137 : vector<8x128xf32>
    %cst_59 = arith.constant 1.000000e+00 : f32
    %139 = vector.broadcast %cst_59 : f32 to vector<8x128xf32>
    %140 = arith.subf %139, %123 : vector<8x128xf32>
    %141 = arith.mulf %140, %109 : vector<8x128xf32>
    %142 = arith.mulf %123, %138 : vector<8x128xf32>
    %143 = arith.addf %141, %142 : vector<8x128xf32>
    %c0_60 = arith.constant 0 : index
    %c0_61 = arith.constant 0 : index
    %144 = vector.load %arg9[%c0_60, %c0_61] : memref<8x128xf32, #tpu.memory_space<vmem>>, vector<8x128xf32>
    tpu.vector_store %arg9[%c0_60, %c0_61], %143 {strides = array<i32>} : memref<8x128xf32, #tpu.memory_space<vmem>>, vector<8x128xf32>,
    %145 = arith.addi %14, %c2_i32 : i32
    %146 = vector.broadcast %145 : i32 to vector<8x1xi32>
    %147 = arith.cmpi sgt, %13, %146 : vector<8x1xi32>
    %148 = arith.extui %147 : vector<8x1xi1> to vector<8x1xi32>
    %149 = arith.sitofp %148 : vector<8x1xi32> to vector<8x1xf32>
    %150 = vector.broadcast %149 : vector<8x1xf32> to vector<8x128xf32>
    %151 = arith.mulf %143, %150 : vector<8x128xf32>
    %152 = arith.index_cast %c2_i32 : i32 to index
    %c0_62 = arith.constant 0 : index
    %c0_63 = arith.constant 0 : index
    %153 = vector.load %arg8[%152, %c0_62, %c0_63] : memref<8x8x128xf32, #tpu.memory_space<vmem>>, vector<1x8x128xf32>
    %154 = vector.shape_cast %153 : vector<1x8x128xf32> to vector<8x128xf32>
    %155 = vector.shape_cast %151 : vector<8x128xf32> to vector<1x8x128xf32>
    tpu.vector_store %arg8[%152, %c0_62, %c0_63], %155 {strides = array<i32>} : memref<8x8x128xf32, #tpu.memory_space<vmem>>, vector<1x8x128xf32>,
    %c3_i32 = arith.constant 3 : i32
    %c0_64 = arith.constant 0 : index
    %c0_65 = arith.constant 0 : index
    %156 = vector.load %arg9[%c0_64, %c0_65] : memref<8x128xf32, #tpu.memory_space<vmem>>, vector<8x128xf32>
    %157 = arith.index_cast %c3_i32 : i32 to index
    %c0_66 = arith.constant 0 : index
    %c0_67 = arith.constant 0 : index
    %158 = vector.load %arg10[%157, %c0_66, %c0_67] : memref<8x8x384xf32, #tpu.memory_space<vmem>>, vector<1x8x384xf32>
    %159 = vector.shape_cast %158 : vector<1x8x384xf32> to vector<8x384xf32>
    %160 = arith.truncf %156 : vector<8x128xf32> to vector<8x128xbf16>
    %c0_68 = arith.constant 0 : index
    %c0_69 = arith.constant 0 : index
    %161 = vector.load %arg5[%c0_68, %c0_69] : memref<128x256xbf16, #tpu.memory_space<vmem>>, vector<128x256xbf16>
    %cst_70 = arith.constant dense<0.000000e+00> : vector<8x256xf32>
    %162 = tpu.matmul %160, %161, %cst_70 {dimension_numbers = #tpu.dot_dimension_numbers<[1], [0], [0], [1], [0, 0, 1, 1], [], []>} : vector<8x128xbf16>, vector<128x256xbf16>, vector<8x256xf32> -> vector<8x256xf32>
    %163 = vector.extract_strided_slice %159 {offsets = [0, 0], sizes = [8, 128], strides = [1, 1]} : vector<8x384xf32> to vector<8x128xf32>
    %164 = vector.extract_strided_slice %162 {offsets = [0, 0], sizes = [8, 128], strides = [1, 1]} : vector<8x256xf32> to vector<8x128xf32>
    %165 = arith.addf %163, %164 : vector<8x128xf32>
    %166 = arith.negf %165 : vector<8x128xf32>
    %167 = math.exp %166 : vector<8x128xf32>
    %cst_71 = arith.constant 1.000000e+00 : f32
    %168 = vector.broadcast %cst_71 : f32 to vector<8x128xf32>
    %169 = arith.addf %168, %167 : vector<8x128xf32>
    %170 = arith.divf %168, %169 : vector<8x128xf32>
    %171 = vector.extract_strided_slice %159 {offsets = [0, 128], sizes = [8, 128], strides = [1, 1]} : vector<8x384xf32> to vector<8x128xf32>
    %172 = vector.extract_strided_slice %162 {offsets = [0, 128], sizes = [8, 128], strides = [1, 1]} : vector<8x256xf32> to vector<8x128xf32>
    %173 = arith.addf %171, %172 : vector<8x128xf32>
    %174 = arith.negf %173 : vector<8x128xf32>
    %175 = math.exp %174 : vector<8x128xf32>
    %cst_72 = arith.constant 1.000000e+00 : f32
    %176 = vector.broadcast %cst_72 : f32 to vector<8x128xf32>
    %177 = arith.addf %176, %175 : vector<8x128xf32>
    %178 = arith.divf %176, %177 : vector<8x128xf32>
    %179 = arith.mulf %178, %156 : vector<8x128xf32>
    %180 = arith.truncf %179 : vector<8x128xf32> to vector<8x128xbf16>
    %c0_73 = arith.constant 0 : index
    %c0_74 = arith.constant 0 : index
    %181 = vector.load %arg6[%c0_73, %c0_74] : memref<128x128xbf16, #tpu.memory_space<vmem>>, vector<128x128xbf16>
    %cst_75 = arith.constant dense<0.000000e+00> : vector<8x128xf32>
    %182 = tpu.matmul %180, %181, %cst_75 {dimension_numbers = #tpu.dot_dimension_numbers<[1], [0], [0], [1], [0, 0, 1, 1], [], []>} : vector<8x128xbf16>, vector<128x128xbf16>, vector<8x128xf32> -> vector<8x128xf32>
    %183 = vector.extract_strided_slice %159 {offsets = [0, 256], sizes = [8, 128], strides = [1, 1]} : vector<8x384xf32> to vector<8x128xf32>
    %184 = arith.addf %183, %182 : vector<8x128xf32>
    %185 = math.tanh %184 : vector<8x128xf32>
    %cst_76 = arith.constant 1.000000e+00 : f32
    %186 = vector.broadcast %cst_76 : f32 to vector<8x128xf32>
    %187 = arith.subf %186, %170 : vector<8x128xf32>
    %188 = arith.mulf %187, %156 : vector<8x128xf32>
    %189 = arith.mulf %170, %185 : vector<8x128xf32>
    %190 = arith.addf %188, %189 : vector<8x128xf32>
    %c0_77 = arith.constant 0 : index
    %c0_78 = arith.constant 0 : index
    %191 = vector.load %arg9[%c0_77, %c0_78] : memref<8x128xf32, #tpu.memory_space<vmem>>, vector<8x128xf32>
    tpu.vector_store %arg9[%c0_77, %c0_78], %190 {strides = array<i32>} : memref<8x128xf32, #tpu.memory_space<vmem>>, vector<8x128xf32>,
    %192 = arith.addi %14, %c3_i32 : i32
    %193 = vector.broadcast %192 : i32 to vector<8x1xi32>
    %194 = arith.cmpi sgt, %13, %193 : vector<8x1xi32>
    %195 = arith.extui %194 : vector<8x1xi1> to vector<8x1xi32>
    %196 = arith.sitofp %195 : vector<8x1xi32> to vector<8x1xf32>
    %197 = vector.broadcast %196 : vector<8x1xf32> to vector<8x128xf32>
    %198 = arith.mulf %190, %197 : vector<8x128xf32>
    %199 = arith.index_cast %c3_i32 : i32 to index
    %c0_79 = arith.constant 0 : index
    %c0_80 = arith.constant 0 : index
    %200 = vector.load %arg8[%199, %c0_79, %c0_80] : memref<8x8x128xf32, #tpu.memory_space<vmem>>, vector<1x8x128xf32>
    %201 = vector.shape_cast %200 : vector<1x8x128xf32> to vector<8x128xf32>
    %202 = vector.shape_cast %198 : vector<8x128xf32> to vector<1x8x128xf32>
    tpu.vector_store %arg8[%199, %c0_79, %c0_80], %202 {strides = array<i32>} : memref<8x8x128xf32, #tpu.memory_space<vmem>>, vector<1x8x128xf32>,
    %c4_i32 = arith.constant 4 : i32
    %c0_81 = arith.constant 0 : index
    %c0_82 = arith.constant 0 : index
    %203 = vector.load %arg9[%c0_81, %c0_82] : memref<8x128xf32, #tpu.memory_space<vmem>>, vector<8x128xf32>
    %204 = arith.index_cast %c4_i32 : i32 to index
    %c0_83 = arith.constant 0 : index
    %c0_84 = arith.constant 0 : index
    %205 = vector.load %arg10[%204, %c0_83, %c0_84] : memref<8x8x384xf32, #tpu.memory_space<vmem>>, vector<1x8x384xf32>
    %206 = vector.shape_cast %205 : vector<1x8x384xf32> to vector<8x384xf32>
    %207 = arith.truncf %203 : vector<8x128xf32> to vector<8x128xbf16>
    %c0_85 = arith.constant 0 : index
    %c0_86 = arith.constant 0 : index
    %208 = vector.load %arg5[%c0_85, %c0_86] : memref<128x256xbf16, #tpu.memory_space<vmem>>, vector<128x256xbf16>
    %cst_87 = arith.constant dense<0.000000e+00> : vector<8x256xf32>
    %209 = tpu.matmul %207, %208, %cst_87 {dimension_numbers = #tpu.dot_dimension_numbers<[1], [0], [0], [1], [0, 0, 1, 1], [], []>} : vector<8x128xbf16>, vector<128x256xbf16>, vector<8x256xf32> -> vector<8x256xf32>
    %210 = vector.extract_strided_slice %206 {offsets = [0, 0], sizes = [8, 128], strides = [1, 1]} : vector<8x384xf32> to vector<8x128xf32>
    %211 = vector.extract_strided_slice %209 {offsets = [0, 0], sizes = [8, 128], strides = [1, 1]} : vector<8x256xf32> to vector<8x128xf32>
    %212 = arith.addf %210, %211 : vector<8x128xf32>
    %213 = arith.negf %212 : vector<8x128xf32>
    %214 = math.exp %213 : vector<8x128xf32>
    %cst_88 = arith.constant 1.000000e+00 : f32
    %215 = vector.broadcast %cst_88 : f32 to vector<8x128xf32>
    %216 = arith.addf %215, %214 : vector<8x128xf32>
    %217 = arith.divf %215, %216 : vector<8x128xf32>
    %218 = vector.extract_strided_slice %206 {offsets = [0, 128], sizes = [8, 128], strides = [1, 1]} : vector<8x384xf32> to vector<8x128xf32>
    %219 = vector.extract_strided_slice %209 {offsets = [0, 128], sizes = [8, 128], strides = [1, 1]} : vector<8x256xf32> to vector<8x128xf32>
    %220 = arith.addf %218, %219 : vector<8x128xf32>
    %221 = arith.negf %220 : vector<8x128xf32>
    %222 = math.exp %221 : vector<8x128xf32>
    %cst_89 = arith.constant 1.000000e+00 : f32
    %223 = vector.broadcast %cst_89 : f32 to vector<8x128xf32>
    %224 = arith.addf %223, %222 : vector<8x128xf32>
    %225 = arith.divf %223, %224 : vector<8x128xf32>
    %226 = arith.mulf %225, %203 : vector<8x128xf32>
    %227 = arith.truncf %226 : vector<8x128xf32> to vector<8x128xbf16>
    %c0_90 = arith.constant 0 : index
    %c0_91 = arith.constant 0 : index
    %228 = vector.load %arg6[%c0_90, %c0_91] : memref<128x128xbf16, #tpu.memory_space<vmem>>, vector<128x128xbf16>
    %cst_92 = arith.constant dense<0.000000e+00> : vector<8x128xf32>
    %229 = tpu.matmul %227, %228, %cst_92 {dimension_numbers = #tpu.dot_dimension_numbers<[1], [0], [0], [1], [0, 0, 1, 1], [], []>} : vector<8x128xbf16>, vector<128x128xbf16>, vector<8x128xf32> -> vector<8x128xf32>
    %230 = vector.extract_strided_slice %206 {offsets = [0, 256], sizes = [8, 128], strides = [1, 1]} : vector<8x384xf32> to vector<8x128xf32>
    %231 = arith.addf %230, %229 : vector<8x128xf32>
    %232 = math.tanh %231 : vector<8x128xf32>
    %cst_93 = arith.constant 1.000000e+00 : f32
    %233 = vector.broadcast %cst_93 : f32 to vector<8x128xf32>
    %234 = arith.subf %233, %217 : vector<8x128xf32>
    %235 = arith.mulf %234, %203 : vector<8x128xf32>
    %236 = arith.mulf %217, %232 : vector<8x128xf32>
    %237 = arith.addf %235, %236 : vector<8x128xf32>
    %c0_94 = arith.constant 0 : index
    %c0_95 = arith.constant 0 : index
    %238 = vector.load %arg9[%c0_94, %c0_95] : memref<8x128xf32, #tpu.memory_space<vmem>>, vector<8x128xf32>
    tpu.vector_store %arg9[%c0_94, %c0_95], %237 {strides = array<i32>} : memref<8x128xf32, #tpu.memory_space<vmem>>, vector<8x128xf32>,
    %239 = arith.addi %14, %c4_i32 : i32
    %240 = vector.broadcast %239 : i32 to vector<8x1xi32>
    %241 = arith.cmpi sgt, %13, %240 : vector<8x1xi32>
    %242 = arith.extui %241 : vector<8x1xi1> to vector<8x1xi32>
    %243 = arith.sitofp %242 : vector<8x1xi32> to vector<8x1xf32>
    %244 = vector.broadcast %243 : vector<8x1xf32> to vector<8x128xf32>
    %245 = arith.mulf %237, %244 : vector<8x128xf32>
    %246 = arith.index_cast %c4_i32 : i32 to index
    %c0_96 = arith.constant 0 : index
    %c0_97 = arith.constant 0 : index
    %247 = vector.load %arg8[%246, %c0_96, %c0_97] : memref<8x8x128xf32, #tpu.memory_space<vmem>>, vector<1x8x128xf32>
    %248 = vector.shape_cast %247 : vector<1x8x128xf32> to vector<8x128xf32>
    %249 = vector.shape_cast %245 : vector<8x128xf32> to vector<1x8x128xf32>
    tpu.vector_store %arg8[%246, %c0_96, %c0_97], %249 {strides = array<i32>} : memref<8x8x128xf32, #tpu.memory_space<vmem>>, vector<1x8x128xf32>,
    %c5_i32 = arith.constant 5 : i32
    %c0_98 = arith.constant 0 : index
    %c0_99 = arith.constant 0 : index
    %250 = vector.load %arg9[%c0_98, %c0_99] : memref<8x128xf32, #tpu.memory_space<vmem>>, vector<8x128xf32>
    %251 = arith.index_cast %c5_i32 : i32 to index
    %c0_100 = arith.constant 0 : index
    %c0_101 = arith.constant 0 : index
    %252 = vector.load %arg10[%251, %c0_100, %c0_101] : memref<8x8x384xf32, #tpu.memory_space<vmem>>, vector<1x8x384xf32>
    %253 = vector.shape_cast %252 : vector<1x8x384xf32> to vector<8x384xf32>
    %254 = arith.truncf %250 : vector<8x128xf32> to vector<8x128xbf16>
    %c0_102 = arith.constant 0 : index
    %c0_103 = arith.constant 0 : index
    %255 = vector.load %arg5[%c0_102, %c0_103] : memref<128x256xbf16, #tpu.memory_space<vmem>>, vector<128x256xbf16>
    %cst_104 = arith.constant dense<0.000000e+00> : vector<8x256xf32>
    %256 = tpu.matmul %254, %255, %cst_104 {dimension_numbers = #tpu.dot_dimension_numbers<[1], [0], [0], [1], [0, 0, 1, 1], [], []>} : vector<8x128xbf16>, vector<128x256xbf16>, vector<8x256xf32> -> vector<8x256xf32>
    %257 = vector.extract_strided_slice %253 {offsets = [0, 0], sizes = [8, 128], strides = [1, 1]} : vector<8x384xf32> to vector<8x128xf32>
    %258 = vector.extract_strided_slice %256 {offsets = [0, 0], sizes = [8, 128], strides = [1, 1]} : vector<8x256xf32> to vector<8x128xf32>
    %259 = arith.addf %257, %258 : vector<8x128xf32>
    %260 = arith.negf %259 : vector<8x128xf32>
    %261 = math.exp %260 : vector<8x128xf32>
    %cst_105 = arith.constant 1.000000e+00 : f32
    %262 = vector.broadcast %cst_105 : f32 to vector<8x128xf32>
    %263 = arith.addf %262, %261 : vector<8x128xf32>
    %264 = arith.divf %262, %263 : vector<8x128xf32>
    %265 = vector.extract_strided_slice %253 {offsets = [0, 128], sizes = [8, 128], strides = [1, 1]} : vector<8x384xf32> to vector<8x128xf32>
    %266 = vector.extract_strided_slice %256 {offsets = [0, 128], sizes = [8, 128], strides = [1, 1]} : vector<8x256xf32> to vector<8x128xf32>
    %267 = arith.addf %265, %266 : vector<8x128xf32>
    %268 = arith.negf %267 : vector<8x128xf32>
    %269 = math.exp %268 : vector<8x128xf32>
    %cst_106 = arith.constant 1.000000e+00 : f32
    %270 = vector.broadcast %cst_106 : f32 to vector<8x128xf32>
    %271 = arith.addf %270, %269 : vector<8x128xf32>
    %272 = arith.divf %270, %271 : vector<8x128xf32>
    %273 = arith.mulf %272, %250 : vector<8x128xf32>
    %274 = arith.truncf %273 : vector<8x128xf32> to vector<8x128xbf16>
    %c0_107 = arith.constant 0 : index
    %c0_108 = arith.constant 0 : index
    %275 = vector.load %arg6[%c0_107, %c0_108] : memref<128x128xbf16, #tpu.memory_space<vmem>>, vector<128x128xbf16>
    %cst_109 = arith.constant dense<0.000000e+00> : vector<8x128xf32>
    %276 = tpu.matmul %274, %275, %cst_109 {dimension_numbers = #tpu.dot_dimension_numbers<[1], [0], [0], [1], [0, 0, 1, 1], [], []>} : vector<8x128xbf16>, vector<128x128xbf16>, vector<8x128xf32> -> vector<8x128xf32>
    %277 = vector.extract_strided_slice %253 {offsets = [0, 256], sizes = [8, 128], strides = [1, 1]} : vector<8x384xf32> to vector<8x128xf32>
    %278 = arith.addf %277, %276 : vector<8x128xf32>
    %279 = math.tanh %278 : vector<8x128xf32>
    %cst_110 = arith.constant 1.000000e+00 : f32
    %280 = vector.broadcast %cst_110 : f32 to vector<8x128xf32>
    %281 = arith.subf %280, %264 : vector<8x128xf32>
    %282 = arith.mulf %281, %250 : vector<8x128xf32>
    %283 = arith.mulf %264, %279 : vector<8x128xf32>
    %284 = arith.addf %282, %283 : vector<8x128xf32>
    %c0_111 = arith.constant 0 : index
    %c0_112 = arith.constant 0 : index
    %285 = vector.load %arg9[%c0_111, %c0_112] : memref<8x128xf32, #tpu.memory_space<vmem>>, vector<8x128xf32>
    tpu.vector_store %arg9[%c0_111, %c0_112], %284 {strides = array<i32>} : memref<8x128xf32, #tpu.memory_space<vmem>>, vector<8x128xf32>,
    %286 = arith.addi %14, %c5_i32 : i32
    %287 = vector.broadcast %286 : i32 to vector<8x1xi32>
    %288 = arith.cmpi sgt, %13, %287 : vector<8x1xi32>
    %289 = arith.extui %288 : vector<8x1xi1> to vector<8x1xi32>
    %290 = arith.sitofp %289 : vector<8x1xi32> to vector<8x1xf32>
    %291 = vector.broadcast %290 : vector<8x1xf32> to vector<8x128xf32>
    %292 = arith.mulf %284, %291 : vector<8x128xf32>
    %293 = arith.index_cast %c5_i32 : i32 to index
    %c0_113 = arith.constant 0 : index
    %c0_114 = arith.constant 0 : index
    %294 = vector.load %arg8[%293, %c0_113, %c0_114] : memref<8x8x128xf32, #tpu.memory_space<vmem>>, vector<1x8x128xf32>
    %295 = vector.shape_cast %294 : vector<1x8x128xf32> to vector<8x128xf32>
    %296 = vector.shape_cast %292 : vector<8x128xf32> to vector<1x8x128xf32>
    tpu.vector_store %arg8[%293, %c0_113, %c0_114], %296 {strides = array<i32>} : memref<8x8x128xf32, #tpu.memory_space<vmem>>, vector<1x8x128xf32>,
    %c6_i32 = arith.constant 6 : i32
    %c0_115 = arith.constant 0 : index
    %c0_116 = arith.constant 0 : index
    %297 = vector.load %arg9[%c0_115, %c0_116] : memref<8x128xf32, #tpu.memory_space<vmem>>, vector<8x128xf32>
    %298 = arith.index_cast %c6_i32 : i32 to index
    %c0_117 = arith.constant 0 : index
    %c0_118 = arith.constant 0 : index
    %299 = vector.load %arg10[%298, %c0_117, %c0_118] : memref<8x8x384xf32, #tpu.memory_space<vmem>>, vector<1x8x384xf32>
    %300 = vector.shape_cast %299 : vector<1x8x384xf32> to vector<8x384xf32>
    %301 = arith.truncf %297 : vector<8x128xf32> to vector<8x128xbf16>
    %c0_119 = arith.constant 0 : index
    %c0_120 = arith.constant 0 : index
    %302 = vector.load %arg5[%c0_119, %c0_120] : memref<128x256xbf16, #tpu.memory_space<vmem>>, vector<128x256xbf16>
    %cst_121 = arith.constant dense<0.000000e+00> : vector<8x256xf32>
    %303 = tpu.matmul %301, %302, %cst_121 {dimension_numbers = #tpu.dot_dimension_numbers<[1], [0], [0], [1], [0, 0, 1, 1], [], []>} : vector<8x128xbf16>, vector<128x256xbf16>, vector<8x256xf32> -> vector<8x256xf32>
    %304 = vector.extract_strided_slice %300 {offsets = [0, 0], sizes = [8, 128], strides = [1, 1]} : vector<8x384xf32> to vector<8x128xf32>
    %305 = vector.extract_strided_slice %303 {offsets = [0, 0], sizes = [8, 128], strides = [1, 1]} : vector<8x256xf32> to vector<8x128xf32>
    %306 = arith.addf %304, %305 : vector<8x128xf32>
    %307 = arith.negf %306 : vector<8x128xf32>
    %308 = math.exp %307 : vector<8x128xf32>
    %cst_122 = arith.constant 1.000000e+00 : f32
    %309 = vector.broadcast %cst_122 : f32 to vector<8x128xf32>
    %310 = arith.addf %309, %308 : vector<8x128xf32>
    %311 = arith.divf %309, %310 : vector<8x128xf32>
    %312 = vector.extract_strided_slice %300 {offsets = [0, 128], sizes = [8, 128], strides = [1, 1]} : vector<8x384xf32> to vector<8x128xf32>
    %313 = vector.extract_strided_slice %303 {offsets = [0, 128], sizes = [8, 128], strides = [1, 1]} : vector<8x256xf32> to vector<8x128xf32>
    %314 = arith.addf %312, %313 : vector<8x128xf32>
    %315 = arith.negf %314 : vector<8x128xf32>
    %316 = math.exp %315 : vector<8x128xf32>
    %cst_123 = arith.constant 1.000000e+00 : f32
    %317 = vector.broadcast %cst_123 : f32 to vector<8x128xf32>
    %318 = arith.addf %317, %316 : vector<8x128xf32>
    %319 = arith.divf %317, %318 : vector<8x128xf32>
    %320 = arith.mulf %319, %297 : vector<8x128xf32>
    %321 = arith.truncf %320 : vector<8x128xf32> to vector<8x128xbf16>
    %c0_124 = arith.constant 0 : index
    %c0_125 = arith.constant 0 : index
    %322 = vector.load %arg6[%c0_124, %c0_125] : memref<128x128xbf16, #tpu.memory_space<vmem>>, vector<128x128xbf16>
    %cst_126 = arith.constant dense<0.000000e+00> : vector<8x128xf32>
    %323 = tpu.matmul %321, %322, %cst_126 {dimension_numbers = #tpu.dot_dimension_numbers<[1], [0], [0], [1], [0, 0, 1, 1], [], []>} : vector<8x128xbf16>, vector<128x128xbf16>, vector<8x128xf32> -> vector<8x128xf32>
    %324 = vector.extract_strided_slice %300 {offsets = [0, 256], sizes = [8, 128], strides = [1, 1]} : vector<8x384xf32> to vector<8x128xf32>
    %325 = arith.addf %324, %323 : vector<8x128xf32>
    %326 = math.tanh %325 : vector<8x128xf32>
    %cst_127 = arith.constant 1.000000e+00 : f32
    %327 = vector.broadcast %cst_127 : f32 to vector<8x128xf32>
    %328 = arith.subf %327, %311 : vector<8x128xf32>
    %329 = arith.mulf %328, %297 : vector<8x128xf32>
    %330 = arith.mulf %311, %326 : vector<8x128xf32>
    %331 = arith.addf %329, %330 : vector<8x128xf32>
    %c0_128 = arith.constant 0 : index
    %c0_129 = arith.constant 0 : index
    %332 = vector.load %arg9[%c0_128, %c0_129] : memref<8x128xf32, #tpu.memory_space<vmem>>, vector<8x128xf32>
    tpu.vector_store %arg9[%c0_128, %c0_129], %331 {strides = array<i32>} : memref<8x128xf32, #tpu.memory_space<vmem>>, vector<8x128xf32>,
    %333 = arith.addi %14, %c6_i32 : i32
    %334 = vector.broadcast %333 : i32 to vector<8x1xi32>
    %335 = arith.cmpi sgt, %13, %334 : vector<8x1xi32>
    %336 = arith.extui %335 : vector<8x1xi1> to vector<8x1xi32>
    %337 = arith.sitofp %336 : vector<8x1xi32> to vector<8x1xf32>
    %338 = vector.broadcast %337 : vector<8x1xf32> to vector<8x128xf32>
    %339 = arith.mulf %331, %338 : vector<8x128xf32>
    %340 = arith.index_cast %c6_i32 : i32 to index
    %c0_130 = arith.constant 0 : index
    %c0_131 = arith.constant 0 : index
    %341 = vector.load %arg8[%340, %c0_130, %c0_131] : memref<8x8x128xf32, #tpu.memory_space<vmem>>, vector<1x8x128xf32>
    %342 = vector.shape_cast %341 : vector<1x8x128xf32> to vector<8x128xf32>
    %343 = vector.shape_cast %339 : vector<8x128xf32> to vector<1x8x128xf32>
    tpu.vector_store %arg8[%340, %c0_130, %c0_131], %343 {strides = array<i32>} : memref<8x8x128xf32, #tpu.memory_space<vmem>>, vector<1x8x128xf32>,
    %c7_i32 = arith.constant 7 : i32
    %c0_132 = arith.constant 0 : index
    %c0_133 = arith.constant 0 : index
    %344 = vector.load %arg9[%c0_132, %c0_133] : memref<8x128xf32, #tpu.memory_space<vmem>>, vector<8x128xf32>
    %345 = arith.index_cast %c7_i32 : i32 to index
    %c0_134 = arith.constant 0 : index
    %c0_135 = arith.constant 0 : index
    %346 = vector.load %arg10[%345, %c0_134, %c0_135] : memref<8x8x384xf32, #tpu.memory_space<vmem>>, vector<1x8x384xf32>
    %347 = vector.shape_cast %346 : vector<1x8x384xf32> to vector<8x384xf32>
    %348 = arith.truncf %344 : vector<8x128xf32> to vector<8x128xbf16>
    %c0_136 = arith.constant 0 : index
    %c0_137 = arith.constant 0 : index
    %349 = vector.load %arg5[%c0_136, %c0_137] : memref<128x256xbf16, #tpu.memory_space<vmem>>, vector<128x256xbf16>
    %cst_138 = arith.constant dense<0.000000e+00> : vector<8x256xf32>
    %350 = tpu.matmul %348, %349, %cst_138 {dimension_numbers = #tpu.dot_dimension_numbers<[1], [0], [0], [1], [0, 0, 1, 1], [], []>} : vector<8x128xbf16>, vector<128x256xbf16>, vector<8x256xf32> -> vector<8x256xf32>
    %351 = vector.extract_strided_slice %347 {offsets = [0, 0], sizes = [8, 128], strides = [1, 1]} : vector<8x384xf32> to vector<8x128xf32>
    %352 = vector.extract_strided_slice %350 {offsets = [0, 0], sizes = [8, 128], strides = [1, 1]} : vector<8x256xf32> to vector<8x128xf32>
    %353 = arith.addf %351, %352 : vector<8x128xf32>
    %354 = arith.negf %353 : vector<8x128xf32>
    %355 = math.exp %354 : vector<8x128xf32>
    %cst_139 = arith.constant 1.000000e+00 : f32
    %356 = vector.broadcast %cst_139 : f32 to vector<8x128xf32>
    %357 = arith.addf %356, %355 : vector<8x128xf32>
    %358 = arith.divf %356, %357 : vector<8x128xf32>
    %359 = vector.extract_strided_slice %347 {offsets = [0, 128], sizes = [8, 128], strides = [1, 1]} : vector<8x384xf32> to vector<8x128xf32>
    %360 = vector.extract_strided_slice %350 {offsets = [0, 128], sizes = [8, 128], strides = [1, 1]} : vector<8x256xf32> to vector<8x128xf32>
    %361 = arith.addf %359, %360 : vector<8x128xf32>
    %362 = arith.negf %361 : vector<8x128xf32>
    %363 = math.exp %362 : vector<8x128xf32>
    %cst_140 = arith.constant 1.000000e+00 : f32
    %364 = vector.broadcast %cst_140 : f32 to vector<8x128xf32>
    %365 = arith.addf %364, %363 : vector<8x128xf32>
    %366 = arith.divf %364, %365 : vector<8x128xf32>
    %367 = arith.mulf %366, %344 : vector<8x128xf32>
    %368 = arith.truncf %367 : vector<8x128xf32> to vector<8x128xbf16>
    %c0_141 = arith.constant 0 : index
    %c0_142 = arith.constant 0 : index
    %369 = vector.load %arg6[%c0_141, %c0_142] : memref<128x128xbf16, #tpu.memory_space<vmem>>, vector<128x128xbf16>
    %cst_143 = arith.constant dense<0.000000e+00> : vector<8x128xf32>
    %370 = tpu.matmul %368, %369, %cst_143 {dimension_numbers = #tpu.dot_dimension_numbers<[1], [0], [0], [1], [0, 0, 1, 1], [], []>} : vector<8x128xbf16>, vector<128x128xbf16>, vector<8x128xf32> -> vector<8x128xf32>
    %371 = vector.extract_strided_slice %347 {offsets = [0, 256], sizes = [8, 128], strides = [1, 1]} : vector<8x384xf32> to vector<8x128xf32>
    %372 = arith.addf %371, %370 : vector<8x128xf32>
    %373 = math.tanh %372 : vector<8x128xf32>
    %cst_144 = arith.constant 1.000000e+00 : f32
    %374 = vector.broadcast %cst_144 : f32 to vector<8x128xf32>
    %375 = arith.subf %374, %358 : vector<8x128xf32>
    %376 = arith.mulf %375, %344 : vector<8x128xf32>
    %377 = arith.mulf %358, %373 : vector<8x128xf32>
    %378 = arith.addf %376, %377 : vector<8x128xf32>
    %c0_145 = arith.constant 0 : index
    %c0_146 = arith.constant 0 : index
    %379 = vector.load %arg9[%c0_145, %c0_146] : memref<8x128xf32, #tpu.memory_space<vmem>>, vector<8x128xf32>
    tpu.vector_store %arg9[%c0_145, %c0_146], %378 {strides = array<i32>} : memref<8x128xf32, #tpu.memory_space<vmem>>, vector<8x128xf32>,
    %380 = arith.addi %14, %c7_i32 : i32
    %381 = vector.broadcast %380 : i32 to vector<8x1xi32>
    %382 = arith.cmpi sgt, %13, %381 : vector<8x1xi32>
    %383 = arith.extui %382 : vector<8x1xi1> to vector<8x1xi32>
    %384 = arith.sitofp %383 : vector<8x1xi32> to vector<8x1xf32>
    %385 = vector.broadcast %384 : vector<8x1xf32> to vector<8x128xf32>
    %386 = arith.mulf %378, %385 : vector<8x128xf32>
    %387 = arith.index_cast %c7_i32 : i32 to index
    %c0_147 = arith.constant 0 : index
    %c0_148 = arith.constant 0 : index
    %388 = vector.load %arg8[%387, %c0_147, %c0_148] : memref<8x8x128xf32, #tpu.memory_space<vmem>>, vector<1x8x128xf32>
    %389 = vector.shape_cast %388 : vector<1x8x128xf32> to vector<8x128xf32>
    %390 = vector.shape_cast %386 : vector<8x128xf32> to vector<1x8x128xf32>
    tpu.vector_store %arg8[%387, %c0_147, %c0_148], %390 {strides = array<i32>} : memref<8x8x128xf32, #tpu.memory_space<vmem>>, vector<1x8x128xf32>,
    %c8_i32_149 = arith.constant 8 : i32
    return
  }
  func.func @transform_0(%arg0: i32, %arg1: i32) -> (i32, i32, i32) {
    %c0_i32 = arith.constant 0 : i32
    %c0_i32_0 = arith.constant 0 : i32
    return %arg1, %arg0, %c0_i32 : i32, i32, i32
  }
  func.func @transform_1(%arg0: i32, %arg1: i32) -> (i32, i32) {
    %c0_i32 = arith.constant 0 : i32
    %c0_i32_0 = arith.constant 0 : i32
    %c0_i32_1 = arith.constant 0 : i32
    return %c0_i32, %c0_i32_0 : i32, i32
  }
  func.func @transform_2(%arg0: i32, %arg1: i32) -> (i32, i32) {
    %c0_i32 = arith.constant 0 : i32
    %c0_i32_0 = arith.constant 0 : i32
    %c0_i32_1 = arith.constant 0 : i32
    return %c0_i32, %c0_i32_0 : i32, i32
  }
  func.func @transform_3(%arg0: i32, %arg1: i32) -> (i32, i32) {
    %c0_i32 = arith.constant 0 : i32
    %c0_i32_0 = arith.constant 0 : i32
    %c0_i32_1 = arith.constant 0 : i32
    return %c0_i32, %c0_i32_0 : i32, i32
  }
  func.func @transform_4(%arg0: i32, %arg1: i32) -> (i32, i32) {
    %c0_i32 = arith.constant 0 : i32
    %c0_i32_0 = arith.constant 0 : i32
    %c0_i32_1 = arith.constant 0 : i32
    return %c0_i32, %c0_i32_0 : i32, i32
  }
  func.func @transform_5(%arg0: i32, %arg1: i32) -> (i32, i32) {
    %c0_i32 = arith.constant 0 : i32
    %c0_i32_0 = arith.constant 0 : i32
    return %arg0, %c0_i32 : i32, i32
  }
  func.func @transform_6(%arg0: i32, %arg1: i32) -> (i32, i32, i32) {
    %c0_i32 = arith.constant 0 : i32
    %c0_i32_0 = arith.constant 0 : i32
    return %arg1, %arg0, %c0_i32 : i32, i32, i32
  }
}

</mosaic_0001>

<bundles_post_ra>
// kernel: gru_forward.1
= control target key start
LH: loop header
LB: loop body
LE: loop exit
PB: predicated region body
PF: predicated region fallthrough
CT: control target
= control target key end

     0   :  { %11 = vsyncpa [#allocation5], 0  ;;  %s5177_s0 = inlined_call_operand.hbm [shape: f32[16,8,128], index: 0, kind: input, shape index: {}]   ;;  %s5178_s1 = inlined_call_operand.hbm [shape: bf16[128,384], index: 1, kind: input, shape index: {}]   ;;  %s5179_s2 = inlined_call_operand.hbm [shape: f32[1,384], index: 2, kind: input, shape index: {}]   ;;  %s5180_s3 = inlined_call_operand.hbm [shape: bf16[128,256], index: 3, kind: input, shape index: {}]   ;;  %s5181_s4 = inlined_call_operand.hbm [shape: bf16[128,128], index: 4, kind: input, shape index: {}]   ;;  %s5182_s5 = inlined_call_operand.hbm [shape: s32[8,1], index: 5, kind: input, shape index: {}]   ;;  %s5183_s6 = inlined_call_operand.hbm [shape: f32[16,8,128], index: 6, kind: output, shape index: {}]  }
   0x1   :  { %13 = vsyncpa [#allocation5 + $0x1], 0 }
   0x2   :  { %14 = vsyncpa [#allocation8], 0 }
   0x3   :  { %15 = vsyncpa [#allocation11], 0 }
   0x4   :  { %16 = vsyncpa [#allocation14], 0 }
   0x5   :  { %17 = vsyncpa [#allocation6], 0 }
   0x6   :  { %19 = vsyncpa [#allocation6 + $0x1], 0  ;;  %s4371_s21 = smov 0   ;;  %s4373_s22 = smov 0  }
   0x7   :  { %s4375_s23 = smov 0   ;;  %s4377_s24 = smov 0  }
   0x8   :  { %s4379_s25 = smov 0   ;;  %s4381_s26 = smov 0  }
   0x9 LB: > { %s5184_s27 = sadd.s32 4294967295, %s4315_s26   ;;  %p3137_p0 = scmp.ge.s32.totalorder %s4315_s26, 1  ;;  %s4315_s26 = sphi %s4381_s26, %s25_s26   ;;  %s4311_s25 = sphi %s4379_s25, %s5213_s25   ;;  %s4307_s24 = sphi %s4377_s24, %s5212_s24   ;;  %s4303_s23 = sphi %s4375_s23, %s5211_s23   ;;  %s4299_s22 = sphi %s4373_s22, %s5210_s22   ;;  %s4295_s21 = sphi %s4371_s21, %s5209_s21  }
   0xa   : > { %p4405_p1 = scmp.eq.s32.totalorder %s5184_s27, 0  ;;  %p208_p2 = scmp.lt.s32.totalorder %s4315_s26, 3 }
   0xb   : > { %s4317_s30 = smov [#allocation7]   ;;  %s4318_s9 = smov [#allocation10]  }
   0xc   : > { %s5191_s28 = scalar_select %p4405_p1, 1, 0 }
   0xd   : > { %p4410_p3 = pnand %p3137_p0, %p208_p2  ;;  %s220_s7 = sshll.u32 %s4317_s30, 4  ;;  %s4414_s7 = int_to_ptr.vmem [resolvable:$true] %s220_s7 }
   0xe   : > { %s244_s10 = sshll.u32 %s4318_s9, 4  ;;  %s4051_s13 = scalar_lea.hbm %s5178_s1, 3072  ;;  %s4425_s10 = int_to_ptr.vmem [resolvable:$true] %s244_s10 }
   0xf   : > { %s5192_s29 = scalar_select %p4410_p3, 1, 0 }
  0x10   : > { %p3703_p4 = pneg %p4410_p3  ;;  %p4052_p7 = scmp.ne.s32.totalorder %s5178_s1, %s4051_s13 }
  0x11   : > { %p4058_p11 = scmp.lt.u32.totalorder %s4051_s13, %s5178_s1 }
  0x12   : > { %p4421_p6 = pnand %p3703_p4, %p4405_p1 }
  0x14   : > { %p4435_p8 = pneg %p4421_p6 }
  0x16   : > { %p4054_p9 = pnand %p4435_p8, %p4052_p7 }
  0x18   : > { %p4055_p10 = pneg %p4054_p9 }
  0x1a   : > { %p4060_p12 = pnand %p4058_p11, %p4055_p10 }
  0x1c   : > { %4063 = shalt.err (!%p4060_p12)
}
  0x1d   : > { %s4064_s19 = scalar_lea.vmem %s4414_s7, 3072  ;;  %p4072_p4 = scmp.lt.s32.totalorder %s4414_s7, %s4414_s7 }
  0x1e   : > { %p4065_p13 = scmp.ne.s32.totalorder %s4414_s7, %s4064_s19  ;;  %p4073_p5 = scmp.lt.s32.totalorder %s4064_s19, %s4064_s19 }
  0x20   : > { %p4067_p0 = pnand %p4065_p13, %p4435_p8  ;;  %p4074_p7 = por %p4073_p5, %p4072_p4 }
  0x22   : > { %p4068_p2 = pneg %p4067_p0 }
  0x24   : > { %p4075_p9 = pnand %p4074_p7, %p4068_p2 }
  0x26   : > { %4078 = shalt.err (!%p4075_p9)
}
  0x27   : > { %s4319_s20 = smov 192   ;;  %s4320_s30 = smov 12  }
  0x28   : > { %3706 = dma.hbm_to_vmem [thread:$0]  (!%p4421_p6), %s5178_s1, 3072, %s4414_s7, [#allocation8], %s4319_s20, %s4319_s20, %s4320_s30  }
  0x29   : > { %s4079_s14 = scalar_lea.hbm %s5180_s3, 2048 }
  0x2a   : > { %p4080_p5 = scmp.ne.s32.totalorder %s5180_s3, %s4079_s14  ;;  %p4086_p12 = scmp.lt.u32.totalorder %s4079_s14, %s5180_s3 }
  0x2c   : > { %p4082_p10 = pnand %p4080_p5, %p4435_p8 }
  0x2e   : > { %p4083_p11 = pneg %p4082_p10 }
  0x30   : > { %p4088_p13 = pnand %p4086_p12, %p4083_p11 }
  0x32   : > { %4091 = shalt.err (!%p4088_p13)
}
  0x33   : > { %s4092_s7 = scalar_lea.vmem %s4425_s10, 2048  ;;  %p4100_p7 = scmp.lt.s32.totalorder %s4425_s10, %s4425_s10 }
  0x34   : > { %p4093_p0 = scmp.ne.s32.totalorder %s4425_s10, %s4092_s7  ;;  %p4101_p9 = scmp.lt.s32.totalorder %s4092_s7, %s4092_s7 }
  0x36   : > { %p4095_p2 = pnand %p4093_p0, %p4435_p8  ;;  %p4102_p5 = por %p4101_p9, %p4100_p7 }
  0x38   : > { %p4096_p4 = pneg %p4095_p2 }
  0x3a   : > { %p4103_p10 = pnand %p4102_p5, %p4096_p4 }
  0x3c   : > { %4106 = shalt.err (!%p4103_p10)
}
  0x3d   : > { %s5188_s20 = smov 128   ;;  %s5189_s30 = smov 8  }
  0x3e   : > { %3712 = dma.hbm_to_vmem [thread:$0]  (!%p4421_p6), %s5180_s3, 2048, %s4425_s10, [#allocation11], %s5188_s20, %s5188_s20, %s5189_s30  }
  0x3f   : > { %s4323_s12 = smov [#allocation9]   ;;  %s4324_s14 = smov [#allocation12]  }
  0x40   : > { %s234_s13 = sshll.u32 %s4323_s12, 4  ;;  %s257_s15 = sshll.u32 %s4324_s14, 4  ;;  %s235_s13 = int_to_ptr.vmem [resolvable:$true] %s234_s13  ;;  %s4482_s15 = int_to_ptr.vmem [resolvable:$true] %s257_s15 }
  0x41   : > { %s4107_s19 = scalar_lea.hbm %s5179_s2, 48 }
  0x42   : > { %p4108_p11 = scmp.ne.s32.totalorder %s5179_s2, %s4107_s19  ;;  %p4114_p0 = scmp.lt.u32.totalorder %s4107_s19, %s5179_s2 }
  0x44   : > { %p4110_p12 = pnand %p4108_p11, %p4435_p8 }
  0x46   : > { %p4111_p13 = pneg %p4110_p12 }
  0x48   : > { %p4116_p2 = pnand %p4114_p0, %p4111_p13 }
  0x4a   : > { %4119 = shalt.err (!%p4116_p2)
}
  0x4b   : > { %s4120_s11 = scalar_lea.vmem %s235_s13, 48  ;;  %s4127_s12 = scalar_lea.vmem %s235_s13, 64 }
  0x4c   : > { %p4121_p4 = scmp.ne.s32.totalorder %s235_s13, %s4120_s11  ;;  %p4128_p5 = scmp.lt.s32.totalorder %s235_s13, %s235_s13 }
  0x4d   : > { %p4129_p10 = scmp.lt.s32.totalorder %s4127_s12, %s4120_s11 }
  0x4e   : > { %p4123_p7 = pnand %p4121_p4, %p4435_p8 }
  0x4f   : > { %p4130_p3 = por %p4129_p10, %p4128_p5 }
  0x50   : > { %p4124_p9 = pneg %p4123_p7 }
  0x52   : > { %p4131_p1 = pnand %p4130_p3, %p4124_p9 }
  0x54   : > { %4134 = shalt.err (!%p4131_p1)
}
  0x55   : > { %3709 = dma.hbm_to_vmem [thread:$0]  (!%p4421_p6), %s5179_s2, 48, %s235_s13, [#allocation8]  }
  0x56   : > { %s4135_s19 = scalar_lea.hbm %s5181_s4, 1024 }
  0x57   : > { %p4136_p11 = scmp.ne.s32.totalorder %s5181_s4, %s4135_s19  ;;  %p4142_p1 = scmp.lt.u32.totalorder %s4135_s19, %s5181_s4 }
  0x59   : > { %p4138_p12 = pnand %p4136_p11, %p4435_p8 }
  0x5b   : > { %p4139_p13 = pneg %p4138_p12 }
  0x5d   : > { %p4144_p3 = pnand %p4142_p1, %p4139_p13 }
  0x5f   : > { %4147 = shalt.err (!%p4144_p3)
}
  0x60   : > { %s4148_s13 = scalar_lea.vmem %s4482_s15, 1024  ;;  %p4156_p7 = scmp.lt.s32.totalorder %s4482_s15, %s4482_s15 }
  0x61   : > { %p4149_p0 = scmp.ne.s32.totalorder %s4482_s15, %s4148_s13  ;;  %p4157_p9 = scmp.lt.s32.totalorder %s4148_s13, %s4148_s13 }
  0x63   : > { %p4151_p2 = pnand %p4149_p0, %p4435_p8  ;;  %p4158_p5 = por %p4157_p9, %p4156_p7 }
  0x65   : > { %p4152_p4 = pneg %p4151_p2 }
  0x67   : > { %p4159_p10 = pnand %p4158_p5, %p4152_p4 }
  0x69   : > { %4162 = shalt.err (!%p4159_p10)
}
  0x6a   : > { %s4325_s12 = smov 64   ;;  %s4326_s27 = smov 4  }
  0x6b   : > { %3715 = dma.hbm_to_vmem [thread:$0]  (!%p4421_p6), %s5181_s4, 1024, %s4482_s15, [#allocation11], %s4325_s12, %s4325_s12, %s4326_s27  }
  0x6c   : > { %s4327_s18 = smov [#allocation13]   ;;  %s4163_s10 = scalar_lea.hbm %s5182_s5, 128 }
  0x6d   : > { %s273_s19 = sshll.u32 %s4327_s18, 4  ;;  %p4164_p11 = scmp.ne.s32.totalorder %s5182_s5, %s4163_s10  ;;  %s274_s19 = int_to_ptr.vmem [resolvable:$true] %s273_s19 }
  0x6e   : > { %p4170_p1 = scmp.lt.u32.totalorder %s4163_s10, %s5182_s5 }
  0x6f   : > { %p4166_p12 = pnand %p4164_p11, %p4435_p8 }
  0x71   : > { %p4167_p13 = pneg %p4166_p12 }
  0x73   : > { %p4172_p3 = pnand %p4170_p1, %p4167_p13 }
  0x75   : > { %4175 = shalt.err (!%p4172_p3)
}
  0x76   : > { %s4176_s15 = scalar_lea.vmem %s274_s19, 128  ;;  %p4184_p7 = scmp.lt.s32.totalorder %s274_s19, %s274_s19 }
  0x77   : > { %p4177_p0 = scmp.ne.s32.totalorder %s274_s19, %s4176_s15  ;;  %p4185_p9 = scmp.lt.s32.totalorder %s4176_s15, %s4176_s15 }
  0x79   : > { %p4179_p2 = pnand %p4177_p0, %p4435_p8  ;;  %p4186_p5 = por %p4185_p9, %p4184_p7 }
  0x7b   : > { %p4180_p4 = pneg %p4179_p2 }
  0x7d   : > { %p4187_p10 = pnand %p4186_p5, %p4180_p4 }
  0x7f   : > { %4190 = shalt.err (!%p4187_p10)
}
  0x80   : > { %3718 = dma.hbm_to_vmem [thread:$0]  (!%p4421_p6), %s5182_s5, 128, %s274_s19, [#allocation14]  }
  0x81   : > { %s3136_s16 = sadd.s32 4294967294, %s4315_s26   ;;  %s34_s20 = sadd.s32 1, %s4311_s25 }
  0x82   : > { %s46_s8 = sadd.s32 1, %s4303_s23  ;;  %p35_p8 = scmp.ge.s32.totalorder %s34_s20, 2 }
  0x83   : > { %p53_p11 = scmp.ne.s32.totalorder %s4303_s23, %s4299_s22  ;;  %p54_p12 = scmp.eq.s32.totalorder %s4315_s26, 0 }
  0x84   : > { %p59_p13 = scmp.ne.s32.totalorder %s4299_s22, %s4295_s21  ;;  %s5215_s20 = smov (%p35_p8, %s34_s20), 0 }
  0x85   : > { %p4553_p1 = por %p54_p12, %p53_p11  ;;  %p5196_p3 = scmp.ne.s32.totalorder %s5191_s28, 0 }
  0x86   : > { %s41_s17 = ssub.s32 %s4311_s25, %s5215_s20  ;;  %s5198_s18 = sadd.s32 4294967295, %s4315_s26  }
  0x87   : > { %p4559_p6 = por %p5196_p3, %p59_p13  ;;  %p195_p0 = scmp.eq.s32.totalorder %s5198_s18, 1 }
  0x88   : > { %p44_p2 = scmp.eq.s32.totalorder %s41_s17, 0  ;;  %p201_p4 = scmp.eq.s32.totalorder %s3136_s16, 1 }
  0x89   : > { %p4567_p7 = por %p195_p0, %p53_p11  ;;  %p3732_p9 = scmp.lt.s32.totalorder %s4315_s26, 2 }
  0x8a   : > { %s4573_s7 = scalar_select %p44_p2, %s4303_s23, %s46_s8  }
  0x8b   : > { %s5199_s19 = scalar_select %p4567_p7, 1, 0 }
  0x8c   : > { %p4575_p5 = por %p201_p4, %p59_p13  ;;  %s284_s10 = sand.u32 1, %s4303_s23  }
  0x8d   : > { %s3144_s11 = sshll.u32 %s284_s10, 6  ;;  %s3409_s13 = sshll.u32 %s4311_s25, 10 }
  0x8e   : > { %s5200_s9 = scalar_select %p4575_p5, 1, 0 }
  0x8f   : > { %s4584_s27 = scalar_lea.hbm %s5177_s0, %s3409_s13  ;;  %s288_s16 = scalar_lea.vmem [#allocation4], %s3144_s11 }
  0x90   : > { %s296_s17 = sshll.u32 %s288_s16, 4  ;;  %p4590_p10 = pnand %p3732_p9, %p4553_p1  ;;  %s4586_s17 = int_to_ptr.vmem [resolvable:$true] %s296_s17 }
  0x91   : > { %s4594_s18 = scalar_lea.sflag [#allocation5], %s284_s10  ;;  %s4191_s15 = scalar_lea.hbm %s4584_s27, 1024 }
  0x92   : > { %p4192_p8 = scmp.ne.s32.totalorder %s4584_s27, %s4191_s15  ;;  %p4193_p11 = pneg %p4590_p10 }
  0x93   : > { %s4196_s30 = scalar_lea.hbm %s5177_s0, 2048  ;;  %p4197_p1 = scmp.lt.u32.totalorder %s4584_s27, %s5177_s0 }
  0x94   : > { %p4194_p12 = pnand %p4193_p11, %p4192_p8  ;;  %p4198_p3 = scmp.lt.u32.totalorder %s4196_s30, %s4191_s15 }
  0x95   : > { %p4200_p2 = scmp.lt.u32.totalorder %s4191_s15, %s4584_s27 }
  0x96   : > { %p4195_p13 = pneg %p4194_p12  ;;  %p4199_p0 = por %p4198_p3, %p4197_p1 }
  0x98   : > { %p4201_p4 = por %p4200_p2, %p4199_p0 }
  0x9a   : > { %p4202_p9 = pnand %p4201_p4, %p4195_p13 }
  0x9c   : > { %4205 = shalt.err (!%p4202_p9)
}
  0x9d   : > { %s4206_s10 = scalar_lea.vmem %s4586_s17, 1024  ;;  %s4328_s11 = smov [#allocation4]  }
  0x9e   : > { %p4207_p8 = scmp.ne.s32.totalorder %s4586_s17, %s4206_s10  ;;  %s4211_s13 = sshll.u32 %s4328_s11, 4  ;;  %s4212_s13 = int_to_ptr.vmem [resolvable:$false] %s4211_s13 }
  0x9f   : > { %s4213_s12 = scalar_lea.vmem %s4212_s13, 2048  ;;  %p4214_p7 = scmp.lt.s32.totalorder %s4586_s17, %s4212_s13 }
  0xa0   : > { %p4209_p12 = pnand %p4207_p8, %p4193_p11  ;;  %p4215_p1 = scmp.lt.s32.totalorder %s4213_s12, %s4206_s10 }
  0xa2   : > { %p4210_p5 = pneg %p4209_p12  ;;  %p4216_p3 = por %p4215_p1, %p4214_p7 }
  0xa4   : > { %p4217_p0 = pnand %p4216_p3, %p4210_p5 }
  0xa6   : > { %4220 = shalt.err (!%p4217_p0)
}
  0xa7   : > { %s5202_s15 = smov 8   ;;  %s5203_s30 = smov 128  }
  0xa8   : > { %3722 = dma.hbm_to_vmem [thread:$0]  (!%p4590_p10), %s4584_s27, 1024, %s4586_s17, %s4594_s18, %s5203_s30, %s5203_s30, %s5202_s15  }
  0xa9   : > { %p5204_p11 = scmp.ne.s32.totalorder %s5192_s29, 0 }
  0xaa   : > { %s4628_s16 = sand.u32 (!%p5204_p11), 1, %s4299_s22  }
  0xab   : > { %308 = sbr.rel (%p5204_p11) target bundleno = 4084 (0xff4), region = 44  ;;  %s3148_s10 = sshll.u32 (!%p5204_p11), %s4628_s16, 6 }
  0xac   : > { %s311_s11 = scalar_lea.sflag (!%p5204_p11), [#allocation5], %s4628_s16  ;;  %s4632_s13 = scalar_lea.vmem (!%p5204_p11), [#allocation4], %s3148_s10 }
  0xb2   : > { %4274 = dma.done.wait (%p4559_p6), %s311_s11, 1024  }
  0xb3   : > { %4276 = vsyncadd (%p4559_p6), %s311_s11, 4294966272  ;;  %p5205_p7 = scmp.ne.s32.totalorder %s5191_s28, 0 }
  0xb5   : > { %4278 = dma.done.wait (%p5205_p7), [#allocation8], 3120  }
  0xb6   : > { %4280 = vsyncadd (%p5205_p7), [#allocation8], 4294964176 }
  0xb7   : > { %4282 = dma.done.wait (%p5205_p7), [#allocation11], 3072  }
  0xb8   : > { %4284 = vsyncadd (%p5205_p7), [#allocation11], 4294964224 }
  0xb9   : > { %4286 = dma.done.wait (%p5205_p7), [#allocation14], 128  }
  0xba   : > { %4288 = vsyncadd (%p5205_p7), [#allocation14], 4294967168  ;;  %s4650_s29 = scalar_lea.vmem [#allocation15], %s3148_s10  ;;  %p3155_p6 = scmp.ne.s32.totalorder %s4307_s24, 0 }
  0xbb   : > { %v4329_v0 = vmov (!%p3155_p6), 0.0  }
  0xbc   : > { %369 = sbr.rel (%p3155_p6) target bundleno = 195 (0xc3), region = 72  ;;  %370 = vst [vmem:[#allocation2] sm:$0xff] (!%p3155_p6), %v4329_v0 }
  0xc3 PF: > { %v3826_v1 = vld [vmem:[#allocation7 + $0x4] ss:$12 sps:$4 sm:$0xff]   ;;  %v3828_v2 = vld [vmem:[#allocation7] ss:$12 sps:$4 sm:$0xff]   ;;  %v4330_v3 = vmov 0   ;;  %v374_v26 = vld [vmem:[%s4632_s13 + $0x18] sm:$0xff] }
  0xc4   : > { %592 = vmatprep.mubr.bf16.mxu0 %v4330_v3  ;;  %3804 = vset.pattern.permute.xlu0 %v4330_v3  ;;  %v3829_v4 = vld [vmem:[#allocation7 + $0x1c] ss:$12 sps:$4 sm:$0xff]   ;;  %v3831_v5 = vld [vmem:[#allocation7 + $0x18] ss:$12 sps:$4 sm:$0xff]   ;;  %v3832_v6 = vld [vmem:[#allocation7 + $0x34] ss:$12 sps:$4 sm:$0xff]  }
  0xc5   : > { %560 = vmatprep.subr.bf16.mxu0 %v3826_v1  ;;  %3815 = vset.pattern.permute.xlu1 %v4330_v3  ;;  %v3834_v7 = vld [vmem:[#allocation7 + $0x30] ss:$12 sps:$4 sm:$0xff]   ;;  %v3835_v8 = vld [vmem:[#allocation7 + $0x4c] ss:$12 sps:$4 sm:$0xff]   ;;  %v3837_v9 = vld [vmem:[#allocation7 + $0x48] ss:$12 sps:$4 sm:$0xff]  }
  0xc6   : > { %561 = vmatpush1.bf16.msra.mxu0 %v3828_v2  ;;  %v371_v10 = vld [vmem:[%s4632_s13] sm:$0xff]  ;;  %v372_v11 = vld [vmem:[%s4632_s13 + $0x8] sm:$0xff]  ;;  %v3846_v18 = vld [vmem:[#allocation7 + $0x90] ss:$12 sps:$4 sm:$0xff]   ;;  %v4331_v57 = vmov 0.0   ;;  %vm4332_vm0 = vmmov 0  }
  0xc7   : > { %562 = vmatprep.subr.bf16.mxu0 %v3829_v4  ;;  %v3838_v12 = vld [vmem:[#allocation7 + $0x64] ss:$12 sps:$4 sm:$0xff]   ;;  %v379_v13 = vpack.c.bf16 %v372_v11, %v371_v10  ;;  %v3840_v14 = vld [vmem:[#allocation7 + $0x60] ss:$12 sps:$4 sm:$0xff]   ;;  %v3841_v15 = vld [vmem:[#allocation7 + $0x7c] ss:$12 sps:$4 sm:$0xff]  }
  0xc8   : > { %v3843_v16 = vld [vmem:[#allocation7 + $0x78] ss:$12 sps:$4 sm:$0xff]   ;;  %v3844_v17 = vld [vmem:[#allocation7 + $0x94] ss:$12 sps:$4 sm:$0xff]   ;;  %v4658_v21 = vld [vmem:[#allocation10 + $0x4] ss:$8 sps:$4 sm:$0xff]  }
  0xc9   : > { %3511 = vmatprep.mubr.bf16.mxu1 %v379_v13  ;;  %v3847_v19 = vld [vmem:[#allocation7 + $0xac] ss:$12 sps:$4 sm:$0xff]   ;;  %v3849_v20 = vld [vmem:[#allocation7 + $0xa8] ss:$12 sps:$4 sm:$0xff]   ;;  %v375_v32 = vld [vmem:[%s4632_s13 + $0x20] sm:$0xff]  ;;  %s4764_s28 = sshll.u32 %s4307_s24, 3 }
  0xca   : > { %563 = vmatpush1.bf16.msra.mxu0 %v3831_v5  ;;  %v4660_v22 = vld [vmem:[#allocation10] ss:$8 sps:$4 sm:$0xff]   ;;  %v4662_v23 = vld [vmem:[#allocation10 + $0x14] ss:$8 sps:$4 sm:$0xff]   ;;  %v4665_v24 = vld [vmem:[#allocation10 + $0x10] ss:$8 sps:$4 sm:$0xff]   ;;  %v993_v2 = vstv %s4764_s28 }
  0xcb   : > { %564 = vmatprep.subr.bf16.mxu0 %v3832_v6  ;;  %v373_v25 = vld [vmem:[%s4632_s13 + $0x10] sm:$0xff]  ;;  %v4674_v28 = vld [vmem:[#allocation10 + $0x20] ss:$8 sps:$4 sm:$0xff]   ;;  %v4678_v30 = vld [vmem:[#allocation10 + $0x34] ss:$8 sps:$4 sm:$0xff]   ;;  %s1274_s14 = sadd.s32 1, %s4764_s28 }
  0xcc   : > { %v4669_v27 = vld [vmem:[#allocation10 + $0x24] ss:$8 sps:$4 sm:$0xff]   ;;  %v4676_v29 = vpack.c.bf16 %v374_v26, %v373_v25  ;;  %v4682_v31 = vld [vmem:[#allocation10 + $0x30] ss:$8 sps:$4 sm:$0xff]   ;;  %v4692_v35 = vld [vmem:[#allocation10 + $0x40] ss:$8 sps:$4 sm:$0xff]   ;;  %v1275_v4 = vstv %s1274_s14 }
  0xcd   : > { %v376_v33 = vld [vmem:[%s4632_s13 + $0x28] sm:$0xff]  ;;  %v4696_v37 = vld [vmem:[#allocation10 + $0x54] ss:$8 sps:$4 sm:$0xff]   ;;  %v4700_v38 = vld [vmem:[#allocation10 + $0x50] ss:$8 sps:$4 sm:$0xff]   ;;  %s1557_s27 = sadd.s32 2, %s4764_s28 }
  0xce   : > { %565 = vmatpush1.bf16.msra.mxu0 %v3834_v7  ;;  %v4687_v34 = vld [vmem:[#allocation10 + $0x44] ss:$8 sps:$4 sm:$0xff]   ;;  %v4694_v36 = vpack.c.bf16 %v376_v33, %v375_v32  ;;  %v378_v40 = vld [vmem:[%s4632_s13 + $0x38] sm:$0xff]  ;;  %v4710_v42 = vld [vmem:[#allocation10 + $0x60] ss:$8 sps:$4 sm:$0xff]   ;;  %s1840_s17 = sadd.s32 3, %s4764_s28 }
  0xcf   : > { %566 = vmatprep.subr.bf16.mxu0 %v3835_v8  ;;  %v377_v39 = vld [vmem:[%s4632_s13 + $0x30] sm:$0xff]  ;;  %v4714_v44 = vld [vmem:[#allocation10 + $0x74] ss:$8 sps:$4 sm:$0xff]   ;;  %v3882_v56 = vld [vmem:[#allocation12] sm:$0xff]   ;;  %v417_v8 = vlaneseq  ;;  %s2123_s8 = sadd.s32 4, %s4764_s28  ;;  %s2406_s18 = sadd.s32 5, %s4764_s28 }
  0xd0   : > { %v4705_v41 = vld [vmem:[#allocation10 + $0x64] ss:$8 sps:$4 sm:$0xff]   ;;  %v4712_v43 = vpack.c.bf16 %v378_v40, %v377_v39  ;;  %v4718_v45 = vld [vmem:[#allocation10 + $0x70] ss:$8 sps:$4 sm:$0xff]   ;;  %v3875_v49 = vld [vmem:[#allocation7 + $0x20] ss:$12 sps:$4 sm:$0xff]  }
  0xd1   : > { %v4720_v46 = vld [vmem:[#allocation2] sm:$0xff]  ;;  %v3874_v48 = vld [vmem:[#allocation7 + $0x8] ss:$12 sps:$4 sm:$0xff]   ;;  %v3879_v53 = vld [vmem:[#allocation7 + $0x80] ss:$12 sps:$4 sm:$0xff]   ;;  %s2689_s12 = sadd.s32 6, %s4764_s28 }
  0xd2   : > { %567 = vmatpush1.bf16.msra.mxu0 %v3837_v9  ;;  %v728_v47 = vpack.c.bf16 %v4720_v46, %v4720_v46  ;;  %3495 = vmatprep.subr.bf16.mxu1 %v3874_v48  ;;  %v3876_v50 = vld [vmem:[#allocation7 + $0x38] ss:$12 sps:$4 sm:$0xff]   ;;  %v3877_v51 = vld [vmem:[#allocation7 + $0x50] ss:$12 sps:$4 sm:$0xff]   ;;  %v3878_v52 = vld [vmem:[#allocation7 + $0x68] ss:$12 sps:$4 sm:$0xff]  }
  0xd3   : > { %568 = vmatprep.subr.bf16.mxu0 %v3838_v12  ;;  %3496 = vmatpush3.bf16.msra.mxu1 %v3874_v48  ;;  %v3880_v54 = vld [vmem:[#allocation7 + $0x98] ss:$12 sps:$4 sm:$0xff]   ;;  %v3881_v55 = vld [vmem:[#allocation7 + $0xb0] ss:$12 sps:$4 sm:$0xff]   ;;  %v418_v9 = vshrl.u32 %v417_v8, 7  ;;  %s2972_s15 = sadd.s32 7, %s4764_s28 }
  0xd4   : > { %3497 = vmatprep.subr.bf16.mxu1 %v3875_v49  ;;  %v3883_v58 = vld [vmem:[#allocation12 + $0x8] sm:$0xff]   ;;  %v3884_v59 = vld [vmem:[#allocation12 + $0x10] sm:$0xff]   ;;  %v3885_v60 = vld [vmem:[#allocation12 + $0x18] sm:$0xff]   ;;  %s3410_s30 = sshll.u32 %s4307_s24, 10  ;;  %s3000_s10 = sshll.u32 %s4650_s29, 4  ;;  %s5127_s10 = int_to_ptr.vmem [resolvable:$true] %s3000_s10 }
  0xd5   : > { %v3886_v61 = vld [vmem:[#allocation12 + $0x20] sm:$0xff]   ;;  %v3887_v62 = vld [vmem:[#allocation12 + $0x28] sm:$0xff]   ;;  %v3888_v63 = vld [vmem:[#allocation12 + $0x30] sm:$0xff]   ;;  %v419_v10 = vsub.s32 0, %v418_v9  ;;  %v423_v12 = vsub.s32 1, %v418_v9  ;;  %s5125_s28 = scalar_lea.hbm %s5183_s6, %s3410_s30  ;;  %s2986_s14 = scalar_lea.sflag [#allocation6], %s4628_s16 }
  0xd6   : > { %569 = vmatpush1.bf16.msra.mxu0 %v3840_v14  ;;  %v3889_v0 = vld [vmem:[#allocation12 + $0x38] sm:$0xff]   ;;  %v4761_v1 = vld [vmem:[#allocation13] sm:$0xff]  ;;  %p5206_p10 = scmp.ne.s32.totalorder %s5199_s19, 0  ;;  %s4333_s24 = smov [#allocation15]  }
  0xd7   : > { %570 = vmatprep.subr.bf16.mxu0 %v3841_v15  ;;  %3498 = vmatpush3.bf16.msra.mxu1 %v3875_v49  ;;  %vm994_vm1 = vcmp.gt.s32.totalorder %v4761_v1, %v993_v2  ;;  %vm1276_vm2 = vcmp.gt.s32.totalorder %v4761_v1, %v1275_v4  ;;  %v415_v11 = vld [vmem:[#allocation9] sm:$0x7] }
  0xd8   : > { %3499 = vmatprep.subr.bf16.mxu1 %v3876_v50  ;;  %v3207_v5 = vsel %vm994_vm1, 1.0, %v4331_v57  ;;  %v3234_v6 = vsel %vm1276_vm2, 1.0, %v4331_v57  ;;  %v420_v14 = vrot.slane %v415_v11, %v419_v10 }
  0xd9   : > { %v3805_v7 = vpack.i.bf16 %v3234_v6, %v3207_v5 }
  0xda   : > { %571 = vmatpush1.bf16.msra.mxu0 %v3843_v16  ;;  %v424_v16 = vrot.slane %v415_v11, %v423_v12 }
  0xdb   : > { %572 = vmatprep.subr.bf16.mxu0 %v3844_v17  ;;  %3500 = vmatpush3.bf16.msra.mxu1 %v3876_v50 }
  0xdc   : > { %3501 = vmatprep.subr.bf16.mxu1 %v3877_v51  ;;  %3806 = vperm.xlu0 %3804, %v3805_v7  }
  0xde   : > { %573 = vmatpush1.bf16.msra.mxu0 %v3846_v18 }
  0xdf   : > { %574 = vmatprep.subr.bf16.mxu0 %v3847_v19  ;;  %3502 = vmatpush3.bf16.msra.mxu1 %v3877_v51 }
  0xe0   : > { %3503 = vmatprep.subr.bf16.mxu1 %v3878_v52 }
  0xe2   : > { %575 = vmatpush1.bf16.msra.mxu0 %v3849_v20 }
  0xe3   : > { %825 = vmatprep.subr.bf16.mxu0 %v4658_v21  ;;  %3504 = vmatpush3.bf16.msra.mxu1 %v3878_v52 }
  0xe4   : > { %3505 = vmatprep.subr.bf16.mxu1 %v3879_v53 }
  0xe5   : > { %593 = vmatmul.mubr.bf16.vlgmr.msra.gmra.mrb[0].mxu0 %v379_v13 }
  0xe6   : > { %826 = vmatpush1.bf16.msra.mxu0 %v4660_v22  ;;  %602 = vmatprep.mubr.bf16.mxu0 %v4330_v3 }
  0xe7   : > { %827 = vmatprep.subr.bf16.mxu0 %v4662_v23  ;;  %3506 = vmatpush3.bf16.msra.mxu1 %v3879_v53 }
  0xe8   : > { %3507 = vmatprep.subr.bf16.mxu1 %v3880_v54 }
  0xea   : > { %828 = vmatpush1.bf16.msra.mxu0 %v4665_v24 }
  0xeb   : > { %829 = vmatprep.subr.bf16.mxu0 %v4669_v27  ;;  %3508 = vmatpush3.bf16.msra.mxu1 %v3880_v54 }
  0xec   : > { %3509 = vmatprep.subr.bf16.mxu1 %v3881_v55 }
  0xed   : > { %603 = vmatmul.mubr.bf16.gmra.mrb[4].mxu0 %v4676_v29 }
  0xee   : > { %830 = vmatpush1.bf16.msra.mxu0 %v4674_v28  ;;  %612 = vmatprep.mubr.bf16.mxu0 %v4330_v3 }
  0xef   : > { %831 = vmatprep.subr.bf16.mxu0 %v4678_v30  ;;  %3510 = vmatpush3.bf16.msra.mxu1 %v3881_v55 }
  0xf0   : > { %3519 = vmatprep.subr.bf16.mxu1 %v4331_v57 }
  0xf2   : > { %832 = vmatpush1.bf16.msra.mxu0 %v4682_v31  ;;  %3512 = vmatmul.mubr.bf16.vlgmr.msra.gmra.mrb[0].mxu1 %v4676_v29 }
  0xf3   : > { %833 = vmatprep.subr.bf16.mxu0 %v4687_v34  ;;  %3515 = vmatprep.mubr.bf16.mxu1 %v4694_v36 }
  0xf4   : > { %3520 = vmatpush3.bf16.msra.mxu1 %v3882_v56 }
  0xf5   : > { %613 = vmatmul.mubr.bf16.gmra.mrb[8].mxu0 %v4694_v36  ;;  %3521 = vmatprep.subr.bf16.mxu1 %v4331_v57 }
  0xf6   : > { %834 = vmatpush1.bf16.msra.mxu0 %v4692_v35  ;;  %622 = vmatprep.mubr.bf16.mxu0 %v4330_v3 }
  0xf7   : > { %835 = vmatprep.subr.bf16.mxu0 %v4696_v37 }
  0xf8   : > { %3522 = vmatpush3.bf16.msra.mxu1 %v3883_v58 }
  0xf9   : > { %3523 = vmatprep.subr.bf16.mxu1 %v4331_v57 }
  0xfa   : > { %836 = vmatpush1.bf16.msra.mxu0 %v4700_v38  ;;  %3516 = vmatmul.mubr.bf16.gmra.mrb[4].mxu1 %v4712_v43 }
  0xfb   : > { %837 = vmatprep.subr.bf16.mxu0 %v4705_v41  ;;  %3535 = vmatprep.mubr.msk.bf16.mxu1 %vm4332_vm0, %v4331_v57 }
  0xfc   : > { %3524 = vmatpush3.bf16.msra.mxu1 %v3884_v59 }
  0xfd   : > { %623 = vmatmul.mubr.bf16.gmra.mrb[12].mxu0 %v4712_v43  ;;  %3525 = vmatprep.subr.bf16.mxu1 %v4331_v57 }
  0xfe   : > { %838 = vmatpush1.bf16.msra.mxu0 %v4710_v42  ;;  %857 = vmatprep.mubr.bf16.mxu0 %v4330_v3 }
  0xff   : > { %839 = vmatprep.subr.bf16.mxu0 %v4714_v44 }
 0x100   : > { %3526 = vmatpush3.bf16.msra.mxu1 %v3885_v60 }
 0x101   : > { %3527 = vmatprep.subr.bf16.mxu1 %v4331_v57 }
 0x102   : > { %840 = vmatpush1.bf16.msra.mxu0 %v4718_v45 }
 0x103   : > { %1106 = vmatprep.subr.bf16.mxu0 %v4658_v21 }
 0x104   : > { %3528 = vmatpush3.bf16.msra.mxu1 %v3886_v61 }
 0x105   : > { %858 = vmatmul.mubr.bf16.vlgmr.msra.gmra.mrb[16].mxu0 %v728_v47  ;;  %3529 = vmatprep.subr.bf16.mxu1 %v4331_v57 }
 0x106   : > { %1107 = vmatpush1.bf16.msra.mxu0 %v4660_v22  ;;  %1138 = vmatprep.mubr.bf16.mxu0 %v4330_v3 }
 0x107   : > { %1108 = vmatprep.subr.bf16.mxu0 %v4662_v23 }
 0x108   : > { %3530 = vmatpush3.bf16.msra.mxu1 %v3887_v62 }
 0x109   : > { %3531 = vmatprep.subr.bf16.mxu1 %v4331_v57 }
 0x10a   : > { %1109 = vmatpush1.bf16.msra.mxu0 %v4665_v24 }
 0x10b   : > { %1110 = vmatprep.subr.bf16.mxu0 %v4669_v27 }
 0x10c   : > { %3532 = vmatpush3.bf16.msra.mxu1 %v3888_v63 }
 0x10d   : > { %3533 = vmatprep.subr.bf16.mxu1 %v4331_v57 }
 0x10e   : > { %1111 = vmatpush1.bf16.msra.mxu0 %v4674_v28 }
 0x10f   : > { %1112 = vmatprep.subr.bf16.mxu0 %v4678_v30 }
 0x110   : > { %3534 = vmatpush3.bf16.msra.mxu1 %v3889_v0 }
 0x111   : > { %3539 = vmatprep.subr.bf16.mxu1 %v4331_v57 }
 0x112   : > { %1113 = vmatpush1.bf16.msra.mxu0 %v4682_v31 }
 0x113   : > { %1114 = vmatprep.subr.bf16.mxu0 %v4687_v34 }
 0x116   : > { %1115 = vmatpush1.bf16.msra.mxu0 %v4692_v35 }
 0x117   : > { %1116 = vmatprep.subr.bf16.mxu0 %v4696_v37 }
 0x11a   : > { %1117 = vmatpush1.bf16.msra.mxu0 %v4700_v38 }
 0x11b   : > { %1118 = vmatprep.subr.bf16.mxu0 %v4705_v41 }
 0x11e   : > { %1119 = vmatpush1.bf16.msra.mxu0 %v4710_v42 }
 0x11f   : > { %1120 = vmatprep.subr.bf16.mxu0 %v4714_v44 }
 0x122   : > { %1121 = vmatpush1.bf16.msra.mxu0 %v4718_v45 }
 0x123   : > { %1389 = vmatprep.subr.bf16.mxu0 %v4658_v21 }
 0x1b8   : > { %v594_v13 = vpop.f32.mrb[0].mxu0 }
 0x1b9   : > { %v596_v15 = vpop.f32.mrb[1].mxu0  ;;  %v595_v63 = vadd.f32 %v594_v13, %v420_v14  ;;  %v427_v13 = vsub.s32 2, %v418_v9 }
 0x1ba   : > { %v598_v17 = vpop.f32.mrb[2].mxu0  ;;  %v597_v0 = vadd.f32 %v596_v15, %v424_v16 }
 0x1bb   : > { %v4772_v18 = vadd.f32 %v598_v17, %v420_v14  ;;  %v600_v19 = vpop.f32.mrb[3].mxu0 }
 0x1bc   : > { %v4774_v20 = vadd.f32 %v600_v19, %v424_v16 }
 0x1c0   : > { %v604_v25 = vpop.f32.mrb[4].mxu0 }
 0x1c1   : > { %v4776_v26 = vadd.f32 %v604_v25, %v420_v14  ;;  %v606_v29 = vpop.f32.mrb[5].mxu0 }
 0x1c2   : > { %v4778_v32 = vadd.f32 %v606_v29, %v424_v16  ;;  %v608_v33 = vpop.f32.mrb[6].mxu0 }
 0x1c3   : > { %v4780_v36 = vadd.f32 %v608_v33, %v420_v14  ;;  %v610_v39 = vpop.f32.mrb[7].mxu0 }
 0x1c4   : > { %v4782_v40 = vadd.f32 %v610_v39, %v424_v16 }
 0x1c5   : > { %v3513_v15 = vpop.f32.mrb[0].mxu1 }
 0x1c6   : > { %v667_v33 = vpop.f32.mrb[1].mxu1 }
 0x1c7   : > { %v3514_v39 = vpop.f32.mrb[2].mxu1 }
 0x1c8   : > { %v614_v43 = vpop.f32.mrb[8].mxu0 }
 0x1c9   : > { %v4784_v47 = vadd.f32 %v614_v43, %v420_v14  ;;  %v616_v48 = vpop.f32.mrb[9].mxu0 }
 0x1ca   : > { %v4786_v49 = vadd.f32 %v616_v48, %v424_v16  ;;  %v618_v50 = vpop.f32.mrb[10].mxu0  ;;  %v670_v48 = vpop.f32.mrb[3].mxu1 }
 0x1cb   : > { %v4788_v51 = vadd.f32 %v618_v50, %v420_v14  ;;  %v620_v52 = vpop.f32.mrb[11].mxu0 }
 0x1cc   : > { %v4790_v53 = vadd.f32 %v620_v52, %v424_v16 }
 0x1cd   : > { %v3517_v52 = vpop.f32.mrb[4].mxu1 }
 0x1d0   : > { %v624_v54 = vpop.f32.mrb[12].mxu0 }
 0x1d1   : > { %v4792_v55 = vadd.f32 %v624_v54, %v420_v14  ;;  %v626_v56 = vpop.f32.mrb[13].mxu0 }
 0x1d2   : > { %v4794_v58 = vadd.f32 %v626_v56, %v424_v16  ;;  %v628_v59 = vpop.f32.mrb[14].mxu0  ;;  %v683_v56 = vpop.f32.mrb[5].mxu1 }
 0x1d3   : > { %v4796_v60 = vadd.f32 %v628_v59, %v420_v14  ;;  %v630_v61 = vpop.f32.mrb[15].mxu0  ;;  %v428_v14 = vrot.slane %v415_v11, %v427_v13 }
 0x1d4   : > { %v4798_v62 = vadd.f32 %v630_v61, %v424_v16  ;;  %v3518_v61 = vpop.f32.mrb[6].mxu1 }
 0x1d5   : > { %v4803_v16 = vadd.f32 %v3513_v15, %v428_v14  ;;  %v4805_v43 = vadd.f32 %v3514_v39, %v428_v14  ;;  %v4807_v50 = vadd.f32 %v670_v48, %v428_v14  ;;  %v4809_v54 = vadd.f32 %v3517_v52, %v428_v14  ;;  %v686_v9 = vpop.f32.mrb[7].mxu1  ;;  %v3891_v52 = vld [vmem:[#allocation12 + $0x8] sm:$0xff]  }
 0x1d6   : > { %v4811_v59 = vadd.f32 %v683_v56, %v428_v14  ;;  %v4815_v11 = vadd.f32 %v686_v9, %v428_v14  ;;  %v3892_v56 = vld [vmem:[#allocation12 + $0x10] sm:$0xff]   ;;  %v3894_v9 = vld [vmem:[#allocation12 + $0x20] sm:$0xff]  }
 0x1d8   : > { %v859_v2 = vpop.f32.mrb[16].mxu0 }
 0x1d9   : > { %v866_v4 = vadd.f32 %v859_v2, %v595_v63  ;;  %v861_v5 = vpop.f32.mrb[17].mxu0  ;;  %v4813_v63 = vadd.f32 %v3518_v61, %v428_v14  ;;  %v3893_v61 = vld [vmem:[#allocation12 + $0x18] sm:$0xff]  }
 0x1da   : > { %v873_v6 = vadd.f32 %v861_v5, %v597_v0  ;;  %v863_v7 = vpop.f32.mrb[18].mxu0 }
 0x1db   : > { %v864_v8 = vpop.f32.mrb[19].mxu0  ;;  %v3197_v0 = vmul.f32 -1.442695, %v866_v4 }
 0x1dc   : > { %v3198_v10 = vmul.f32 -1.442695, %v873_v6  ;;  %v668_v6 = vadd.f32 %v667_v33, %v428_v14 }
 0x1de   : > { %3970 = vpow2.f32 %v3198_v10 }
 0x1e8   : > { %v3971_v12 = vpop.eup %3970 }
 0x1e9   : > { %v877_v17 = vadd.f32 1.0, %v3971_v12 }
 0x1eb   : > { %3972 = vrcp.f32 %v877_v17 }
 0x1ec   : > { %3974 = vpow2.f32 %v3197_v0  ;;  %v3896_v0 = vld [vmem:[#allocation12 + $0x30] sm:$0xff]  }
 0x1f5   : > { %v3973_v19 = vpop.eup %3972 }
 0x1f6   : > { %v880_v25 = vmul.f32 %v3973_v19, %v4720_v46  ;;  %v3975_v2 = vpop.eup %3974 }
 0x1f7   : > { %v870_v5 = vadd.f32 1.0, %v3975_v2  ;;  %v3897_v2 = vld [vmem:[#allocation12 + $0x38] sm:$0xff]  }
 0x1f8   : > { %v881_v29 = vpack.c.bf16 %v880_v25, %v880_v25 }
 0x1f9   : > { %3976 = vrcp.f32 %v870_v5 }
 0x1fa   : > { %3536 = vmatmul.mubr.bf16.vlgmr.msra.gmra.mrb[8].mxu1 %v881_v29  ;;  %v4817_v29 = vpop.permute.xlu0 %3806 }
 0x1fb   : > { %3555 = vmatprep.mubr.msk.bf16.mxu1 %vm4332_vm0, %v4331_v57  ;;  %v3808_v15 = vunpack.i.l.bf16 %v4817_v29 }
 0x203   : > { %v3977_v19 = vpop.eup %3976 }
 0x204   : > { %v988_v25 = vsub.f32 1.0, %v3977_v19 }
 0x206   : > { %v989_v4 = vmul.f32 %v988_v25, %v4720_v46  ;;  %v3890_v46 = vld [vmem:[#allocation12] sm:$0xff]  }
 0x207   : > { %3540 = vmatpush3.bf16.msra.mxu1 %v3890_v46 }
 0x208   : > { %3541 = vmatprep.subr.bf16.mxu1 %v4331_v57 }
 0x20b   : > { %3542 = vmatpush3.bf16.msra.mxu1 %v3891_v52 }
 0x20c   : > { %3543 = vmatprep.subr.bf16.mxu1 %v4331_v57 }
 0x20f   : > { %3544 = vmatpush3.bf16.msra.mxu1 %v3892_v56 }
 0x210   : > { %3545 = vmatprep.subr.bf16.mxu1 %v4331_v57 }
 0x213   : > { %3546 = vmatpush3.bf16.msra.mxu1 %v3893_v61 }
 0x214   : > { %3547 = vmatprep.subr.bf16.mxu1 %v4331_v57 }
 0x217   : > { %3548 = vmatpush3.bf16.msra.mxu1 %v3894_v9 }
 0x218   : > { %3549 = vmatprep.subr.bf16.mxu1 %v4331_v57 }
 0x2cd   : > { %v980_v7 = vpop.f32.mrb[8].mxu1 }
 0x2ce   : > { %v986_v8 = vadd.f32 %v980_v7, %v668_v6  ;;  %v3537_v10 = vpop.f32.mrb[9].mxu1 }
 0x2cf   : > { %v983_v12 = vpop.f32.mrb[10].mxu1 }
 0x2d0   : > { %3978 = vtanh.f32 %v986_v8  ;;  %v3538_v17 = vpop.f32.mrb[11].mxu1 }
 0x2da   : > { %v3979_v13 = vpop.eup %3978 }
 0x2db   : > { %v990_v39 = vmul.f32 %v3979_v13, %v3977_v19 }
 0x2dd   : > { %v4821_v48 = vadd.f32 %v990_v39, %v989_v4 }
 0x2df   : > { %v1002_v14 = vmul.f32 %v3808_v15, %v4821_v48  ;;  %v1009_v33 = vpack.c.bf16 %v4821_v48, %v4821_v48 }
 0x2e1   : > { %1003 = vst [vmem:[%s4650_s29] sm:$0xff] %v1002_v14  ;;  %1139 = vmatmul.mubr.bf16.vlgmr.msra.gmra.mrb[20].mxu0 %v1009_v33 }
 0x2e2   : > { %1390 = vmatpush1.bf16.msra.mxu0 %v4660_v22  ;;  %1421 = vmatprep.mubr.bf16.mxu0 %v4330_v3 }
 0x2e3   : > { %1391 = vmatprep.subr.bf16.mxu0 %v4662_v23 }
 0x2e6   : > { %1392 = vmatpush1.bf16.msra.mxu0 %v4665_v24 }
 0x2e7   : > { %1393 = vmatprep.subr.bf16.mxu0 %v4669_v27 }
 0x2ea   : > { %1394 = vmatpush1.bf16.msra.mxu0 %v4674_v28 }
 0x2eb   : > { %1395 = vmatprep.subr.bf16.mxu0 %v4678_v30 }
 0x2ee   : > { %1396 = vmatpush1.bf16.msra.mxu0 %v4682_v31 }
 0x2ef   : > { %1397 = vmatprep.subr.bf16.mxu0 %v4687_v34 }
 0x2f2   : > { %1398 = vmatpush1.bf16.msra.mxu0 %v4692_v35 }
 0x2f3   : > { %1399 = vmatprep.subr.bf16.mxu0 %v4696_v37 }
 0x2f6   : > { %1400 = vmatpush1.bf16.msra.mxu0 %v4700_v38 }
 0x2f7   : > { %1401 = vmatprep.subr.bf16.mxu0 %v4705_v41 }
 0x2fa   : > { %1402 = vmatpush1.bf16.msra.mxu0 %v4710_v42 }
 0x2fb   : > { %1403 = vmatprep.subr.bf16.mxu0 %v4714_v44 }
 0x2fe   : > { %1404 = vmatpush1.bf16.msra.mxu0 %v4718_v45 }
 0x2ff   : > { %1672 = vmatprep.subr.bf16.mxu0 %v4658_v21  ;;  %v3895_v21 = vld [vmem:[#allocation12 + $0x28] sm:$0xff]  }
 0x300   : > { %3550 = vmatpush3.bf16.msra.mxu1 %v3895_v21 }
 0x301   : > { %3551 = vmatprep.subr.bf16.mxu1 %v4331_v57 }
 0x304   : > { %3552 = vmatpush3.bf16.msra.mxu1 %v3896_v0  ;;  %v3809_v0 = vunpack.i.h.bf16 %v4817_v29 }
 0x305   : > { %3553 = vmatprep.subr.bf16.mxu1 %v4331_v57 }
 0x308   : > { %3554 = vmatpush3.bf16.msra.mxu1 %v3897_v2 }
 0x309   : > { %3559 = vmatprep.subr.bf16.mxu1 %v4331_v57 }
 0x3b4   : > { %v1140_v5 = vpop.f32.mrb[20].mxu0 }
 0x3b5   : > { %v1147_v6 = vadd.f32 %v1140_v5, %v4772_v18  ;;  %v1142_v7 = vpop.f32.mrb[21].mxu0 }
 0x3b6   : > { %v1154_v8 = vadd.f32 %v1142_v7, %v4774_v20  ;;  %v1144_v10 = vpop.f32.mrb[22].mxu0 }
 0x3b7   : > { %v1145_v12 = vpop.f32.mrb[23].mxu0  ;;  %v3224_v39 = vmul.f32 -1.442695, %v1147_v6 }
 0x3b8   : > { %v3225_v17 = vmul.f32 -1.442695, %v1154_v8 }
 0x3ba   : > { %3980 = vpow2.f32 %v3225_v17 }
 0x3c4   : > { %v3981_v19 = vpop.eup %3980 }
 0x3c5   : > { %v1158_v25 = vadd.f32 1.0, %v3981_v19 }
 0x3c7   : > { %3982 = vrcp.f32 %v1158_v25 }
 0x3c8   : > { %3984 = vpow2.f32 %v3224_v39 }
 0x3d1   : > { %v3983_v13 = vpop.eup %3982 }
 0x3d2   : > { %v1161_v15 = vmul.f32 %v3983_v13, %v4821_v48  ;;  %v3985_v18 = vpop.eup %3984 }
 0x3d3   : > { %v1151_v14 = vadd.f32 1.0, %v3985_v18 }
 0x3d4   : > { %v1162_v4 = vpack.c.bf16 %v1161_v15, %v1161_v15 }
 0x3d5   : > { %3986 = vrcp.f32 %v1151_v14 }
 0x3d6   : > { %3556 = vmatmul.mubr.bf16.vlgmr.msra.gmra.mrb[12].mxu1 %v1162_v4 }
 0x3d7   : > { %3575 = vmatprep.mubr.msk.bf16.mxu1 %vm4332_vm0, %v4331_v57 }
 0x3df   : > { %v3987_v61 = vpop.eup %3986 }
 0x3e0   : > { %v1269_v9 = vsub.f32 1.0, %v3987_v61 }
 0x3e2   : > { %v1270_v2 = vmul.f32 %v1269_v9, %v4821_v48 }
 0x4a9   : > { %v1261_v20 = vpop.f32.mrb[12].mxu1 }
 0x4aa   : > { %v1267_v33 = vadd.f32 %v1261_v20, %v4807_v50  ;;  %v3557_v46 = vpop.f32.mrb[13].mxu1 }
 0x4ab   : > { %v1264_v52 = vpop.f32.mrb[14].mxu1 }
 0x4ac   : > { %3988 = vtanh.f32 %v1267_v33  ;;  %v3558_v56 = vpop.f32.mrb[15].mxu1 }
 0x4b6   : > { %v3989_v21 = vpop.eup %3988 }
 0x4b7   : > { %v1271_v5 = vmul.f32 %v3989_v21, %v3987_v61 }
 0x4b9   : > { %v4860_v6 = vadd.f32 %v1271_v5, %v1270_v2 }
 0x4bb   : > { %v1284_v7 = vmul.f32 %v3809_v0, %v4860_v6  ;;  %v1292_v8 = vpack.c.bf16 %v4860_v6, %v4860_v6 }
 0x4bd   : > { %3235 = vst [vmem:[%s4650_s29 + $0x8] sm:$0xff] %v1284_v7  ;;  %1422 = vmatmul.mubr.bf16.vlgmr.msra.gmra.mrb[24].mxu0 %v1292_v8  ;;  %v3906_v7 = vld [vmem:[#allocation12] sm:$0xff]   ;;  %v3907_v8 = vld [vmem:[#allocation12 + $0x8] sm:$0xff]  }
 0x4be   : > { %1673 = vmatpush1.bf16.msra.mxu0 %v4660_v22  ;;  %1704 = vmatprep.mubr.bf16.mxu0 %v4330_v3  ;;  %v3898_v22 = vld [vmem:[#allocation12] sm:$0xff]  }
 0x4bf   : > { %1674 = vmatprep.subr.bf16.mxu0 %v4662_v23  ;;  %3560 = vmatpush3.bf16.msra.mxu1 %v3898_v22  ;;  %v3899_v23 = vld [vmem:[#allocation12 + $0x8] sm:$0xff]   ;;  %v3909_v22 = vld [vmem:[#allocation12 + $0x18] sm:$0xff]  }
 0x4c0   : > { %3561 = vmatprep.subr.bf16.mxu1 %v4331_v57 }
 0x4c2   : > { %1675 = vmatpush1.bf16.msra.mxu0 %v4665_v24  ;;  %v3900_v24 = vld [vmem:[#allocation12 + $0x10] sm:$0xff]  }
 0x4c3   : > { %1676 = vmatprep.subr.bf16.mxu0 %v4669_v27  ;;  %3562 = vmatpush3.bf16.msra.mxu1 %v3899_v23  ;;  %v3901_v27 = vld [vmem:[#allocation12 + $0x18] sm:$0xff]   ;;  %v3910_v23 = vld [vmem:[#allocation12 + $0x20] sm:$0xff]  }
 0x4c4   : > { %3563 = vmatprep.subr.bf16.mxu1 %v4331_v57 }
 0x4c6   : > { %1677 = vmatpush1.bf16.msra.mxu0 %v4674_v28  ;;  %v3902_v28 = vld [vmem:[#allocation12 + $0x20] sm:$0xff]  }
 0x4c7   : > { %1678 = vmatprep.subr.bf16.mxu0 %v4678_v30  ;;  %3564 = vmatpush3.bf16.msra.mxu1 %v3900_v24  ;;  %v3903_v30 = vld [vmem:[#allocation12 + $0x28] sm:$0xff]  }
 0x4c8   : > { %3565 = vmatprep.subr.bf16.mxu1 %v4331_v57  ;;  %v3911_v24 = vld [vmem:[#allocation12 + $0x28] sm:$0xff]  }
 0x4ca   : > { %1679 = vmatpush1.bf16.msra.mxu0 %v4682_v31  ;;  %v3904_v31 = vld [vmem:[#allocation12 + $0x30] sm:$0xff]  }
 0x4cb   : > { %1680 = vmatprep.subr.bf16.mxu0 %v4687_v34  ;;  %3566 = vmatpush3.bf16.msra.mxu1 %v3901_v27  ;;  %v3905_v34 = vld [vmem:[#allocation12 + $0x38] sm:$0xff]   ;;  %v3912_v27 = vld [vmem:[#allocation12 + $0x30] sm:$0xff]  }
 0x4cc   : > { %3567 = vmatprep.subr.bf16.mxu1 %v4331_v57 }
 0x4ce   : > { %1681 = vmatpush1.bf16.msra.mxu0 %v4692_v35  ;;  %v1558_v35 = vstv %s1557_s27  ;;  %s4221_s27 = scalar_lea.vmem %s5127_s10, 1024 }
 0x4cf   : > { %1682 = vmatprep.subr.bf16.mxu0 %v4696_v37  ;;  %3568 = vmatpush3.bf16.msra.mxu1 %v3902_v28  ;;  %v1841_v37 = vstv %s1840_s17  ;;  %vm1559_vm3 = vcmp.gt.s32.totalorder %v4761_v1, %v1558_v35  ;;  %v3913_v28 = vld [vmem:[#allocation12 + $0x38] sm:$0xff]   ;;  %p4222_p5 = scmp.ne.s32.totalorder %s5127_s10, %s4221_s27  ;;  %s4225_s17 = sshll.u32 %s4333_s24, 4  ;;  %s4226_s17 = int_to_ptr.vmem [resolvable:$false] %s4225_s17 }
 0x4d0   : > { %3569 = vmatprep.subr.bf16.mxu1 %v4331_v57  ;;  %vm1842_vm4 = vcmp.gt.s32.totalorder %v4761_v1, %v1841_v37  ;;  %p4228_p4 = scmp.lt.s32.totalorder %s5127_s10, %s4226_s17 }
 0x4d1   : > { %p4223_p13 = pnand %p4222_p5, %p5206_p10 }
 0x4d2   : > { %1683 = vmatpush1.bf16.msra.mxu0 %v4700_v38  ;;  %v3262_v38 = vsel %vm1559_vm3, 1.0, %v4331_v57 }
 0x4d3   : > { %1684 = vmatprep.subr.bf16.mxu0 %v4705_v41  ;;  %3570 = vmatpush3.bf16.msra.mxu1 %v3903_v30  ;;  %v3290_v41 = vsel %vm1842_vm4, 1.0, %v4331_v57  ;;  %v4921_v30 = vld [vmem:[#allocation10] ss:$8 sps:$4 sm:$0xff]   ;;  %p4224_p2 = pneg %p4223_p13 }
 0x4d4   : > { %3571 = vmatprep.subr.bf16.mxu1 %v4331_v57 }
 0x4d6   : > { %1685 = vmatpush1.bf16.msra.mxu0 %v4710_v42  ;;  %v3810_v42 = vpack.i.bf16 %v3290_v41, %v3262_v38 }
 0x4d7   : > { %1686 = vmatprep.subr.bf16.mxu0 %v4714_v44  ;;  %3572 = vmatpush3.bf16.msra.mxu1 %v3904_v31  ;;  %v4923_v31 = vld [vmem:[#allocation10 + $0x4] ss:$8 sps:$4 sm:$0xff]  }
 0x4d8   : > { %3573 = vmatprep.subr.bf16.mxu1 %v4331_v57  ;;  %3811 = vperm.xlu0 %3804, %v3810_v42  }
 0x4da   : > { %1687 = vmatpush1.bf16.msra.mxu0 %v4718_v45 }
 0x4db   : > { %3574 = vmatpush3.bf16.msra.mxu1 %v3905_v34  ;;  %1955 = vmatprep.subr.bf16.mxu0 %v4923_v31 }
 0x4dc   : > { %3579 = vmatprep.subr.bf16.mxu1 %v4331_v57 }
 0x557   : > { %v4902_v56 = vpop.permute.xlu0 %3811 }
 0x558   : > { %v3813_v9 = vunpack.i.l.bf16 %v4902_v56 }
 0x590   : > { %v1423_v44 = vpop.f32.mrb[24].mxu0 }
 0x591   : > { %v1430_v45 = vadd.f32 %v1423_v44, %v4776_v26  ;;  %v1425_v50 = vpop.f32.mrb[25].mxu0 }
 0x592   : > { %v1437_v29 = vadd.f32 %v1425_v50, %v4778_v32  ;;  %v1427_v48 = vpop.f32.mrb[26].mxu0 }
 0x593   : > { %v1428_v10 = vpop.f32.mrb[27].mxu0  ;;  %v3252_v4 = vmul.f32 -1.442695, %v1430_v45 }
 0x594   : > { %v3253_v12 = vmul.f32 -1.442695, %v1437_v29 }
 0x596   : > { %3990 = vpow2.f32 %v3253_v12  ;;  %v4932_v12 = vld [vmem:[#allocation10 + $0x14] ss:$8 sps:$4 sm:$0xff]  }
 0x5a0   : > { %v3991_v17 = vpop.eup %3990 }
 0x5a1   : > { %v1441_v19 = vadd.f32 1.0, %v3991_v17  ;;  %v4940_v17 = vld [vmem:[#allocation10 + $0x20] ss:$8 sps:$4 sm:$0xff]  }
 0x5a3   : > { %3992 = vrcp.f32 %v1441_v19  ;;  %v4944_v19 = vld [vmem:[#allocation10 + $0x34] ss:$8 sps:$4 sm:$0xff]  }
 0x5a4   : > { %3994 = vpow2.f32 %v3252_v4  ;;  %v4956_v4 = vld [vmem:[#allocation10 + $0x54] ss:$8 sps:$4 sm:$0xff]  }
 0x5ad   : > { %v3993_v25 = vpop.eup %3992 }
 0x5ae   : > { %v1444_v13 = vmul.f32 %v3993_v25, %v4860_v6  ;;  %v3995_v26 = vpop.eup %3994  ;;  %v4946_v25 = vld [vmem:[#allocation10 + $0x30] ss:$8 sps:$4 sm:$0xff]  }
 0x5af   : > { %v1434_v39 = vadd.f32 1.0, %v3995_v26  ;;  %v4958_v26 = vld [vmem:[#allocation10 + $0x50] ss:$8 sps:$4 sm:$0xff]  }
 0x5b0   : > { %v1445_v15 = vpack.c.bf16 %v1444_v13, %v1444_v13  ;;  %v4950_v13 = vld [vmem:[#allocation10 + $0x44] ss:$8 sps:$4 sm:$0xff]  }
 0x5b1   : > { %3996 = vrcp.f32 %v1434_v39  ;;  %v4962_v39 = vld [vmem:[#allocation10 + $0x64] ss:$8 sps:$4 sm:$0xff]  }
 0x5b2   : > { %3576 = vmatmul.mubr.bf16.vlgmr.msra.gmra.mrb[16].mxu1 %v1445_v15  ;;  %v4952_v15 = vld [vmem:[#allocation10 + $0x40] ss:$8 sps:$4 sm:$0xff]  }
 0x5b3   : > { %3595 = vmatprep.mubr.msk.bf16.mxu1 %vm4332_vm0, %v4331_v57  ;;  %3580 = vmatpush3.bf16.msra.mxu1 %v3906_v7 }
 0x5b4   : > { %3581 = vmatprep.subr.bf16.mxu1 %v4331_v57 }
 0x5b7   : > { %3582 = vmatpush3.bf16.msra.mxu1 %v3907_v8  ;;  %v3814_v8 = vunpack.i.h.bf16 %v4902_v56  ;;  %v3939_v56 = vld [vmem:[#allocation12 + $0x8] sm:$0xff]  }
 0x5b8   : > { %3583 = vmatprep.subr.bf16.mxu1 %v4331_v57 }
 0x5bb   : > { %v3997_v46 = vpop.eup %3996 }
 0x5bc   : > { %v1552_v52 = vsub.f32 1.0, %v3997_v46 }
 0x5be   : > { %v1553_v21 = vmul.f32 %v1552_v52, %v4860_v6  ;;  %v3908_v6 = vld [vmem:[#allocation12 + $0x10] sm:$0xff]  }
 0x5bf   : > { %3584 = vmatpush3.bf16.msra.mxu1 %v3908_v6 }
 0x5c0   : > { %3585 = vmatprep.subr.bf16.mxu1 %v4331_v57 }
 0x5c3   : > { %3586 = vmatpush3.bf16.msra.mxu1 %v3909_v22 }
 0x5c4   : > { %3587 = vmatprep.subr.bf16.mxu1 %v4331_v57 }
 0x5c7   : > { %3588 = vmatpush3.bf16.msra.mxu1 %v3910_v23 }
 0x5c8   : > { %3589 = vmatprep.subr.bf16.mxu1 %v4331_v57 }
 0x5cb   : > { %3590 = vmatpush3.bf16.msra.mxu1 %v3911_v24 }
 0x5cc   : > { %3591 = vmatprep.subr.bf16.mxu1 %v4331_v57 }
 0x5cf   : > { %3592 = vmatpush3.bf16.msra.mxu1 %v3912_v27 }
 0x5d0   : > { %3593 = vmatprep.subr.bf16.mxu1 %v4331_v57 }
 0x5d3   : > { %3594 = vmatpush3.bf16.msra.mxu1 %v3913_v28  ;;  %v3941_v28 = vld [vmem:[#allocation12 + $0x18] sm:$0xff]  }
 0x5d4   : > { %3599 = vmatprep.subr.bf16.mxu1 %v4331_v57 }
 0x685   : > { %v1544_v32 = vpop.f32.mrb[16].mxu1 }
 0x686   : > { %v1550_v18 = vadd.f32 %v1544_v32, %v4803_v16  ;;  %v3577_v14 = vpop.f32.mrb[17].mxu1  ;;  %v4964_v32 = vld [vmem:[#allocation10 + $0x60] ss:$8 sps:$4 sm:$0xff]  }
 0x687   : > { %v1547_v20 = vpop.f32.mrb[18].mxu1  ;;  %v4970_v14 = vld [vmem:[#allocation10 + $0x70] ss:$8 sps:$4 sm:$0xff]  }
 0x688   : > { %3998 = vtanh.f32 %v1550_v18  ;;  %v3578_v33 = vpop.f32.mrb[19].mxu1  ;;  %v4968_v18 = vld [vmem:[#allocation10 + $0x74] ss:$8 sps:$4 sm:$0xff]  }
 0x692   : > { %v3999_v61 = vpop.eup %3998 }
 0x693   : > { %v1554_v0 = vmul.f32 %v3999_v61, %v3997_v46 }
 0x695   : > { %v4906_v2 = vadd.f32 %v1554_v0, %v1553_v21 }
 0x697   : > { %v1567_v5 = vmul.f32 %v3813_v9, %v4906_v2  ;;  %v1575_v16 = vpack.c.bf16 %v4906_v2, %v4906_v2 }
 0x699   : > { %3263 = vst [vmem:[%s4650_s29 + $0x10] sm:$0xff] %v1567_v5  ;;  %1705 = vmatmul.mubr.bf16.vlgmr.msra.gmra.mrb[28].mxu0 %v1575_v16 }
 0x69a   : > { %1987 = vmatprep.mubr.bf16.mxu0 %v4330_v3  ;;  %1956 = vmatpush1.bf16.msra.mxu0 %v4921_v30 }
 0x69b   : > { %1957 = vmatprep.subr.bf16.mxu0 %v4932_v12 }
 0x76c   : > { %v1706_v34 = vpop.f32.mrb[28].mxu0 }
 0x76d   : > { %v1713_v35 = vadd.f32 %v1706_v34, %v4780_v36  ;;  %v1708_v37 = vpop.f32.mrb[29].mxu0  ;;  %v4934_v36 = vld [vmem:[#allocation10 + $0x10] ss:$8 sps:$4 sm:$0xff]   ;;  %v3942_v34 = vld [vmem:[#allocation12 + $0x20] sm:$0xff]  }
 0x76e   : > { %v1720_v38 = vadd.f32 %v1708_v37, %v4782_v40  ;;  %v1710_v41 = vpop.f32.mrb[30].mxu0  ;;  %1958 = vmatpush1.bf16.msra.mxu0 %v4934_v36  ;;  %v4938_v40 = vld [vmem:[#allocation10 + $0x24] ss:$8 sps:$4 sm:$0xff]   ;;  %v3944_v37 = vld [vmem:[#allocation12 + $0x30] sm:$0xff]  }
 0x76f   : > { %v1711_v42 = vpop.f32.mrb[31].mxu0  ;;  %1959 = vmatprep.subr.bf16.mxu0 %v4938_v40  ;;  %v3280_v20 = vmul.f32 -1.442695, %v1713_v35  ;;  %v3943_v35 = vld [vmem:[#allocation12 + $0x28] sm:$0xff]   ;;  %v2124_v41 = vstv %s2123_s8  ;;  %s4227_s8 = scalar_lea.vmem %s4226_s17, 2048 }
 0x770   : > { %v3281_v44 = vmul.f32 -1.442695, %v1720_v38  ;;  %v3945_v38 = vld [vmem:[#allocation12 + $0x38] sm:$0xff]   ;;  %v2407_v42 = vstv %s2406_s18  ;;  %vm2125_vm5 = vcmp.gt.s32.totalorder %v4761_v1, %v2124_v41  ;;  %v3948_v41 = vld [vmem:[#allocation12 + $0x10] sm:$0xff]   ;;  %p4229_p9 = scmp.lt.s32.totalorder %s4227_s8, %s4221_s27 }
 0x771   : > { %vm2408_vm6 = vcmp.gt.s32.totalorder %v4761_v1, %v2407_v42  ;;  %v3949_v42 = vld [vmem:[#allocation12 + $0x18] sm:$0xff]  }
 0x772   : > { %4000 = vpow2.f32 %v3281_v44  ;;  %1960 = vmatpush1.bf16.msra.mxu0 %v4940_v17  ;;  %v3318_v44 = vsel %vm2125_vm5, 1.0, %v4331_v57  ;;  %p4230_p8 = por %p4229_p9, %p4228_p4 }
 0x773   : > { %1961 = vmatprep.subr.bf16.mxu0 %v4944_v19 }
 0x774   : > { %p4231_p12 = pnand %p4230_p8, %p4224_p2 }
 0x776   : > { %1962 = vmatpush1.bf16.msra.mxu0 %v4946_v25 }
 0x777   : > { %1963 = vmatprep.subr.bf16.mxu0 %v4950_v13 }
 0x77a   : > { %1964 = vmatpush1.bf16.msra.mxu0 %v4952_v15 }
 0x77b   : > { %1965 = vmatprep.subr.bf16.mxu0 %v4956_v4 }
 0x77c   : > { %v4001_v45 = vpop.eup %4000 }
 0x77d   : > { %v1724_v50 = vadd.f32 1.0, %v4001_v45  ;;  %v3346_v45 = vsel %vm2408_vm6, 1.0, %v4331_v57 }
 0x77e   : > { %1966 = vmatpush1.bf16.msra.mxu0 %v4958_v26 }
 0x77f   : > { %4002 = vrcp.f32 %v1724_v50  ;;  %1967 = vmatprep.subr.bf16.mxu0 %v4962_v39  ;;  %v3816_v50 = vpack.i.bf16 %v3346_v45, %v3318_v44  ;;  %v3950_v44 = vld [vmem:[#allocation12 + $0x20] sm:$0xff]   ;;  %v3952_v45 = vld [vmem:[#allocation12 + $0x30] sm:$0xff]  }
 0x780   : > { %4004 = vpow2.f32 %v3280_v20 }
 0x781   : > { %3817 = vperm.xlu1 %3815, %v3816_v50   ;;  %v3953_v50 = vld [vmem:[#allocation12 + $0x38] sm:$0xff]  }
 0x782   : > { %1968 = vmatpush1.bf16.msra.mxu0 %v4964_v32 }
 0x783   : > { %1969 = vmatprep.subr.bf16.mxu0 %v4968_v18 }
 0x786   : > { %1970 = vmatpush1.bf16.msra.mxu0 %v4970_v14 }
 0x787   : > { %2238 = vmatprep.subr.bf16.mxu0 %v4923_v31 }
 0x789   : > { %v4003_v29 = vpop.eup %4002 }
 0x78a   : > { %v1727_v48 = vmul.f32 %v4003_v29, %v4906_v2  ;;  %v4005_v33 = vpop.eup %4004 }
 0x78b   : > { %v1717_v46 = vadd.f32 1.0, %v4005_v33 }
 0x78c   : > { %v1728_v10 = vpack.c.bf16 %v1727_v48, %v1727_v48 }
 0x78d   : > { %4006 = vrcp.f32 %v1717_v46 }
 0x78e   : > { %3596 = vmatmul.mubr.bf16.vlgmr.msra.gmra.mrb[20].mxu1 %v1728_v10 }
 0x78f   : > { %3615 = vmatprep.mubr.msk.bf16.mxu1 %vm4332_vm0, %v4331_v57 }
 0x797   : > { %v4007_v5 = vpop.eup %4006 }
 0x798   : > { %v1835_v16 = vsub.f32 1.0, %v4007_v5 }
 0x79a   : > { %v1836_v6 = vmul.f32 %v1835_v16, %v4906_v2  ;;  %v3940_v2 = vld [vmem:[#allocation12 + $0x10] sm:$0xff]  }
 0x861   : > { %v1827_v52 = vpop.f32.mrb[20].mxu1 }
 0x862   : > { %v1833_v61 = vadd.f32 %v1827_v52, %v4805_v43  ;;  %v3597_v9 = vpop.f32.mrb[21].mxu1  ;;  %v3938_v43 = vld [vmem:[#allocation12] sm:$0xff]  }
 0x863   : > { %v1830_v21 = vpop.f32.mrb[22].mxu1  ;;  %3600 = vmatpush3.bf16.msra.mxu1 %v3938_v43  ;;  %v5021_v43 = vpop.permute.xlu1 %3817 }
 0x864   : > { %4008 = vtanh.f32 %v1833_v61  ;;  %v3598_v0 = vpop.f32.mrb[23].mxu1  ;;  %3601 = vmatprep.subr.bf16.mxu1 %v4331_v57 }
 0x867   : > { %3602 = vmatpush3.bf16.msra.mxu1 %v3939_v56 }
 0x868   : > { %3603 = vmatprep.subr.bf16.mxu1 %v4331_v57 }
 0x86b   : > { %3604 = vmatpush3.bf16.msra.mxu1 %v3940_v2  ;;  %v3819_v2 = vunpack.i.l.bf16 %v5021_v43 }
 0x86c   : > { %3605 = vmatprep.subr.bf16.mxu1 %v4331_v57 }
 0x86e   : > { %v4009_v7 = vpop.eup %4008 }
 0x86f   : > { %v1837_v22 = vmul.f32 %v4009_v7, %v4007_v5  ;;  %3606 = vmatpush3.bf16.msra.mxu1 %v3941_v28 }
 0x870   : > { %3607 = vmatprep.subr.bf16.mxu1 %v4331_v57 }
 0x871   : > { %v4978_v23 = vadd.f32 %v1837_v22, %v1836_v6 }
 0x873   : > { %v1850_v24 = vmul.f32 %v3814_v8, %v4978_v23  ;;  %v1858_v27 = vpack.c.bf16 %v4978_v23, %v4978_v23  ;;  %3608 = vmatpush3.bf16.msra.mxu1 %v3942_v34 }
 0x874   : > { %3609 = vmatprep.subr.bf16.mxu1 %v4331_v57 }
 0x875   : > { %3291 = vst [vmem:[%s4650_s29 + $0x18] sm:$0xff] %v1850_v24  ;;  %1988 = vmatmul.mubr.bf16.vlgmr.msra.gmra.mrb[32].mxu0 %v1858_v27 }
 0x876   : > { %2239 = vmatpush1.bf16.msra.mxu0 %v4921_v30  ;;  %2270 = vmatprep.mubr.bf16.mxu0 %v4330_v3 }
 0x877   : > { %2240 = vmatprep.subr.bf16.mxu0 %v4932_v12  ;;  %3610 = vmatpush3.bf16.msra.mxu1 %v3943_v35 }
 0x878   : > { %3611 = vmatprep.subr.bf16.mxu1 %v4331_v57 }
 0x87a   : > { %2241 = vmatpush1.bf16.msra.mxu0 %v4934_v36 }
 0x87b   : > { %2242 = vmatprep.subr.bf16.mxu0 %v4938_v40  ;;  %3612 = vmatpush3.bf16.msra.mxu1 %v3944_v37 }
 0x87c   : > { %3613 = vmatprep.subr.bf16.mxu1 %v4331_v57 }
 0x87e   : > { %2243 = vmatpush1.bf16.msra.mxu0 %v4940_v17 }
 0x87f   : > { %2244 = vmatprep.subr.bf16.mxu0 %v4944_v19  ;;  %3614 = vmatpush3.bf16.msra.mxu1 %v3945_v38  ;;  %v3947_v38 = vld [vmem:[#allocation12 + $0x8] sm:$0xff]  }
 0x880   : > { %3619 = vmatprep.subr.bf16.mxu1 %v4331_v57 }
 0x882   : > { %2245 = vmatpush1.bf16.msra.mxu0 %v4946_v25 }
 0x883   : > { %2246 = vmatprep.subr.bf16.mxu0 %v4950_v13 }
 0x886   : > { %2247 = vmatpush1.bf16.msra.mxu0 %v4952_v15 }
 0x887   : > { %2248 = vmatprep.subr.bf16.mxu0 %v4956_v4 }
 0x88a   : > { %2249 = vmatpush1.bf16.msra.mxu0 %v4958_v26 }
 0x88b   : > { %2250 = vmatprep.subr.bf16.mxu0 %v4962_v39 }
 0x88e   : > { %2251 = vmatpush1.bf16.msra.mxu0 %v4964_v32 }
 0x88f   : > { %2252 = vmatprep.subr.bf16.mxu0 %v4968_v18 }
 0x892   : > { %2253 = vmatpush1.bf16.msra.mxu0 %v4970_v14 }
 0x893   : > { %2521 = vmatprep.subr.bf16.mxu0 %v4923_v31 }
 0x948   : > { %v1989_v29 = vpop.f32.mrb[32].mxu0 }
 0x949   : > { %v1996_v48 = vadd.f32 %v1989_v29, %v4784_v47  ;;  %v1991_v10 = vpop.f32.mrb[33].mxu0 }
 0x94a   : > { %v2003_v20 = vadd.f32 %v1991_v10, %v4786_v49  ;;  %v1993_v33 = vpop.f32.mrb[34].mxu0 }
 0x94b   : > { %v1994_v46 = vpop.f32.mrb[35].mxu0  ;;  %v3308_v5 = vmul.f32 -1.442695, %v1996_v48 }
 0x94c   : > { %v3309_v52 = vmul.f32 -1.442695, %v2003_v20 }
 0x94e   : > { %4010 = vpow2.f32 %v3309_v52 }
 0x958   : > { %v4011_v61 = vpop.eup %4010 }
 0x959   : > { %v2007_v9 = vadd.f32 1.0, %v4011_v61 }
 0x95b   : > { %4012 = vrcp.f32 %v2007_v9 }
 0x95c   : > { %4014 = vpow2.f32 %v3308_v5 }
 0x965   : > { %v4013_v1 = vpop.eup %4012 }
 0x966   : > { %v2010_v21 = vmul.f32 %v4013_v1, %v4978_v23  ;;  %v4015_v47 = vpop.eup %4014 }
 0x967   : > { %v2000_v16 = vadd.f32 1.0, %v4015_v47 }
 0x968   : > { %v2011_v0 = vpack.c.bf16 %v2010_v21, %v2010_v21 }
 0x969   : > { %4016 = vrcp.f32 %v2000_v16 }
 0x96a   : > { %3616 = vmatmul.mubr.bf16.vlgmr.msra.gmra.mrb[24].mxu1 %v2011_v0 }
 0x96b   : > { %3635 = vmatprep.mubr.msk.bf16.mxu1 %vm4332_vm0, %v4331_v57 }
 0x973   : > { %v4017_v24 = vpop.eup %4016 }
 0x974   : > { %v2118_v27 = vsub.f32 1.0, %v4017_v24 }
 0x976   : > { %v2119_v28 = vmul.f32 %v2118_v27, %v4978_v23  ;;  %v3946_v23 = vld [vmem:[#allocation12] sm:$0xff]   ;;  %v3820_v27 = vunpack.i.h.bf16 %v5021_v43 }
 0x977   : > { %3620 = vmatpush3.bf16.msra.mxu1 %v3946_v23 }
 0x978   : > { %3621 = vmatprep.subr.bf16.mxu1 %v4331_v57 }
 0x97b   : > { %3622 = vmatpush3.bf16.msra.mxu1 %v3947_v38 }
 0x97c   : > { %3623 = vmatprep.subr.bf16.mxu1 %v4331_v57 }
 0x97f   : > { %3624 = vmatpush3.bf16.msra.mxu1 %v3948_v41 }
 0x980   : > { %3625 = vmatprep.subr.bf16.mxu1 %v4331_v57 }
 0x983   : > { %3626 = vmatpush3.bf16.msra.mxu1 %v3949_v42 }
 0x984   : > { %3627 = vmatprep.subr.bf16.mxu1 %v4331_v57 }
 0x987   : > { %3628 = vmatpush3.bf16.msra.mxu1 %v3950_v44 }
 0x988   : > { %3629 = vmatprep.subr.bf16.mxu1 %v4331_v57 }
 0xa3d   : > { %v2110_v49 = vpop.f32.mrb[24].mxu1 }
 0xa3e   : > { %v2116_v7 = vadd.f32 %v2110_v49, %v4811_v59  ;;  %v3617_v8 = vpop.f32.mrb[25].mxu1 }
 0xa3f   : > { %v2113_v6 = vpop.f32.mrb[26].mxu1 }
 0xa40   : > { %4018 = vtanh.f32 %v2116_v7  ;;  %v3618_v22 = vpop.f32.mrb[27].mxu1 }
 0xa4a   : > { %v4019_v56 = vpop.eup %4018 }
 0xa4b   : > { %v2120_v34 = vmul.f32 %v4019_v56, %v4017_v24 }
 0xa4d   : > { %v5025_v35 = vadd.f32 %v2120_v34, %v2119_v28 }
 0xa4f   : > { %v2133_v37 = vmul.f32 %v3819_v2, %v5025_v35  ;;  %v2141_v59 = vpack.c.bf16 %v5025_v35, %v5025_v35 }
 0xa51   : > { %3319 = vst [vmem:[%s4650_s29 + $0x20] sm:$0xff] %v2133_v37  ;;  %2271 = vmatmul.mubr.bf16.vlgmr.msra.gmra.mrb[36].mxu0 %v2141_v59 }
 0xa52   : > { %2522 = vmatpush1.bf16.msra.mxu0 %v4921_v30  ;;  %2553 = vmatprep.mubr.bf16.mxu0 %v4330_v3 }
 0xa53   : > { %2523 = vmatprep.subr.bf16.mxu0 %v4932_v12 }
 0xa56   : > { %2524 = vmatpush1.bf16.msra.mxu0 %v4934_v36 }
 0xa57   : > { %2525 = vmatprep.subr.bf16.mxu0 %v4938_v40 }
 0xa5a   : > { %2526 = vmatpush1.bf16.msra.mxu0 %v4940_v17 }
 0xa5b   : > { %2527 = vmatprep.subr.bf16.mxu0 %v4944_v19 }
 0xa5e   : > { %2528 = vmatpush1.bf16.msra.mxu0 %v4946_v25 }
 0xa5f   : > { %2529 = vmatprep.subr.bf16.mxu0 %v4950_v13 }
 0xa62   : > { %2530 = vmatpush1.bf16.msra.mxu0 %v4952_v15 }
 0xa63   : > { %2531 = vmatprep.subr.bf16.mxu0 %v4956_v4 }
 0xa66   : > { %2532 = vmatpush1.bf16.msra.mxu0 %v4958_v26 }
 0xa67   : > { %2533 = vmatprep.subr.bf16.mxu0 %v4962_v39 }
 0xa6a   : > { %2534 = vmatpush1.bf16.msra.mxu0 %v4964_v32 }
 0xa6b   : > { %2535 = vmatprep.subr.bf16.mxu0 %v4968_v18 }
 0xa6e   : > { %2536 = vmatpush1.bf16.msra.mxu0 %v4970_v14 }
 0xa6f   : > { %2804 = vmatprep.subr.bf16.mxu0 %v4923_v31  ;;  %v3951_v31 = vld [vmem:[#allocation12 + $0x28] sm:$0xff]  }
 0xa70   : > { %3630 = vmatpush3.bf16.msra.mxu1 %v3951_v31 }
 0xa71   : > { %3631 = vmatprep.subr.bf16.mxu1 %v4331_v57 }
 0xa74   : > { %3632 = vmatpush3.bf16.msra.mxu1 %v3952_v45 }
 0xa75   : > { %3633 = vmatprep.subr.bf16.mxu1 %v4331_v57 }
 0xa78   : > { %3634 = vmatpush3.bf16.msra.mxu1 %v3953_v50 }
 0xa79   : > { %3639 = vmatprep.subr.bf16.mxu1 %v4331_v57 }
 0xb24   : > { %v2272_v29 = vpop.f32.mrb[36].mxu0 }
 0xb25   : > { %v2279_v48 = vadd.f32 %v2272_v29, %v4788_v51  ;;  %v2274_v10 = vpop.f32.mrb[37].mxu0 }
 0xb26   : > { %v2286_v20 = vadd.f32 %v2274_v10, %v4790_v53  ;;  %v2276_v33 = vpop.f32.mrb[38].mxu0 }
 0xb27   : > { %v2277_v46 = vpop.f32.mrb[39].mxu0  ;;  %v3336_v5 = vmul.f32 -1.442695, %v2279_v48 }
 0xb28   : > { %v3337_v52 = vmul.f32 -1.442695, %v2286_v20 }
 0xb2a   : > { %4020 = vpow2.f32 %v3337_v52 }
 0xb34   : > { %v4021_v61 = vpop.eup %4020 }
 0xb35   : > { %v2290_v9 = vadd.f32 1.0, %v4021_v61 }
 0xb37   : > { %4022 = vrcp.f32 %v2290_v9 }
 0xb38   : > { %4024 = vpow2.f32 %v3336_v5 }
 0xb41   : > { %v4023_v1 = vpop.eup %4022 }
 0xb42   : > { %v2293_v21 = vmul.f32 %v4023_v1, %v5025_v35  ;;  %v4025_v51 = vpop.eup %4024 }
 0xb43   : > { %v2283_v47 = vadd.f32 1.0, %v4025_v51 }
 0xb44   : > { %v2294_v0 = vpack.c.bf16 %v2293_v21, %v2293_v21 }
 0xb45   : > { %4026 = vrcp.f32 %v2283_v47  ;;  %v3963_v47 = vld [vmem:[#allocation12 + $0x8] sm:$0xff]  }
 0xb46   : > { %3636 = vmatmul.mubr.bf16.vlgmr.msra.gmra.mrb[28].mxu1 %v2294_v0 }
 0xb47   : > { %3655 = vmatprep.mubr.msk.bf16.mxu1 %vm4332_vm0, %v4331_v57 }
 0xb4f   : > { %v4027_v6 = vpop.eup %4026 }
 0xb50   : > { %v2401_v22 = vsub.f32 1.0, %v4027_v6 }
 0xb52   : > { %v2402_v56 = vmul.f32 %v2401_v22, %v5025_v35 }
 0xc19   : > { %v2393_v53 = vpop.f32.mrb[28].mxu1 }
 0xc1a   : > { %v2399_v16 = vadd.f32 %v2393_v53, %v4815_v11  ;;  %v3637_v49 = vpop.f32.mrb[29].mxu1  ;;  %v3955_v11 = vld [vmem:[#allocation12 + $0x8] sm:$0xff]   ;;  %v3964_v53 = vld [vmem:[#allocation12 + $0x10] sm:$0xff]  }
 0xc1b   : > { %v2396_v7 = vpop.f32.mrb[30].mxu1  ;;  %v3966_v49 = vld [vmem:[#allocation12 + $0x20] sm:$0xff]  }
 0xc1c   : > { %4028 = vtanh.f32 %v2399_v16  ;;  %v3638_v8 = vpop.f32.mrb[31].mxu1  ;;  %v3965_v16 = vld [vmem:[#allocation12 + $0x18] sm:$0xff]   ;;  %v3967_v7 = vld [vmem:[#allocation12 + $0x28] sm:$0xff]  }
 0xc1d   : > { %v3968_v8 = vld [vmem:[#allocation12 + $0x30] sm:$0xff]  }
 0xc26   : > { %v4029_v24 = vpop.eup %4028 }
 0xc27   : > { %v2403_v2 = vmul.f32 %v4029_v24, %v4027_v6  ;;  %v3969_v6 = vld [vmem:[#allocation12 + $0x38] sm:$0xff]  }
 0xc29   : > { %v5064_v28 = vadd.f32 %v2403_v2, %v2402_v56 }
 0xc2b   : > { %v2416_v34 = vmul.f32 %v3820_v27, %v5064_v28  ;;  %v2424_v37 = vpack.c.bf16 %v5064_v28, %v5064_v28 }
 0xc2d   : > { %3347 = vst [vmem:[%s4650_s29 + $0x28] sm:$0xff] %v2416_v34  ;;  %2554 = vmatmul.mubr.bf16.vlgmr.msra.gmra.mrb[40].mxu0 %v2424_v37 }
 0xc2e   : > { %2805 = vmatpush1.bf16.msra.mxu0 %v4921_v30  ;;  %2836 = vmatprep.mubr.bf16.mxu0 %v4330_v3  ;;  %v3954_v3 = vld [vmem:[#allocation12] sm:$0xff]   ;;  %v3956_v30 = vld [vmem:[#allocation12 + $0x10] sm:$0xff]  }
 0xc2f   : > { %2806 = vmatprep.subr.bf16.mxu0 %v4932_v12  ;;  %3640 = vmatpush3.bf16.msra.mxu1 %v3954_v3  ;;  %v3957_v12 = vld [vmem:[#allocation12 + $0x18] sm:$0xff]  }
 0xc30   : > { %3641 = vmatprep.subr.bf16.mxu1 %v4331_v57 }
 0xc32   : > { %2807 = vmatpush1.bf16.msra.mxu0 %v4934_v36  ;;  %v3958_v36 = vld [vmem:[#allocation12 + $0x20] sm:$0xff]  }
 0xc33   : > { %2808 = vmatprep.subr.bf16.mxu0 %v4938_v40  ;;  %3642 = vmatpush3.bf16.msra.mxu1 %v3955_v11  ;;  %v3959_v40 = vld [vmem:[#allocation12 + $0x28] sm:$0xff]  }
 0xc34   : > { %3643 = vmatprep.subr.bf16.mxu1 %v4331_v57 }
 0xc36   : > { %2809 = vmatpush1.bf16.msra.mxu0 %v4940_v17  ;;  %v3960_v17 = vld [vmem:[#allocation12 + $0x30] sm:$0xff]  }
 0xc37   : > { %2810 = vmatprep.subr.bf16.mxu0 %v4944_v19  ;;  %3644 = vmatpush3.bf16.msra.mxu1 %v3956_v30  ;;  %v3961_v19 = vld [vmem:[#allocation12 + $0x38] sm:$0xff]  }
 0xc38   : > { %3645 = vmatprep.subr.bf16.mxu1 %v4331_v57 }
 0xc3a   : > { %2811 = vmatpush1.bf16.msra.mxu0 %v4946_v25  ;;  %v2690_v25 = vstv %s2689_s12 }
 0xc3b   : > { %2812 = vmatprep.subr.bf16.mxu0 %v4950_v13  ;;  %3646 = vmatpush3.bf16.msra.mxu1 %v3957_v12  ;;  %v2973_v13 = vstv %s2972_s15 }
 0xc3c   : > { %3647 = vmatprep.subr.bf16.mxu1 %v4331_v57 }
 0xc3e   : > { %2813 = vmatpush1.bf16.msra.mxu0 %v4952_v15  ;;  %v4050_v15 = vld [vmem:[#allocation13] sm:$0xff] }
 0xc3f   : > { %2814 = vmatprep.subr.bf16.mxu0 %v4956_v4  ;;  %3648 = vmatpush3.bf16.msra.mxu1 %v3958_v36  ;;  %vm2691_vm7 = vcmp.gt.s32.totalorder %v4050_v15, %v2690_v25  ;;  %vm2974_vm8 = vcmp.gt.s32.totalorder %v4050_v15, %v2973_v13 }
 0xc40   : > { %3649 = vmatprep.subr.bf16.mxu1 %v4331_v57  ;;  %v3374_v4 = vsel %vm2691_vm7, 1.0, %v4331_v57 }
 0xc42   : > { %2815 = vmatpush1.bf16.msra.mxu0 %v4958_v26  ;;  %v3402_v26 = vsel %vm2974_vm8, 1.0, %v4331_v57 }
 0xc43   : > { %2816 = vmatprep.subr.bf16.mxu0 %v4962_v39  ;;  %3650 = vmatpush3.bf16.msra.mxu1 %v3959_v40  ;;  %v3821_v39 = vpack.i.bf16 %v3402_v26, %v3374_v4 }
 0xc44   : > { %3651 = vmatprep.subr.bf16.mxu1 %v4331_v57 }
 0xc45   : > { %3822 = vperm.xlu1 %3815, %v3821_v39  }
 0xc46   : > { %2817 = vmatpush1.bf16.msra.mxu0 %v4964_v32 }
 0xc47   : > { %2818 = vmatprep.subr.bf16.mxu0 %v4968_v18  ;;  %3652 = vmatpush3.bf16.msra.mxu1 %v3960_v17 }
 0xc48   : > { %3653 = vmatprep.subr.bf16.mxu1 %v4331_v57 }
 0xc4a   : > { %2819 = vmatpush1.bf16.msra.mxu0 %v4970_v14 }
 0xc4b   : > { %3654 = vmatpush3.bf16.msra.mxu1 %v3961_v19 }
 0xc4c   : > { %3659 = vmatprep.subr.bf16.mxu1 %v4331_v57 }
 0xcc4   : > { %v5104_v52 = vpop.permute.xlu1 %3822 }
 0xcc5   : > { %v3824_v9 = vunpack.i.l.bf16 %v5104_v52 }
 0xd00   : > { %v2555_v32 = vpop.f32.mrb[40].mxu0 }
 0xd01   : > { %v2562_v18 = vadd.f32 %v2555_v32, %v4792_v55  ;;  %v2557_v14 = vpop.f32.mrb[41].mxu0  ;;  %v3825_v32 = vunpack.i.h.bf16 %v5104_v52 }
 0xd02   : > { %v2569_v43 = vadd.f32 %v2557_v14, %v4794_v58  ;;  %v2559_v35 = vpop.f32.mrb[42].mxu0 }
 0xd03   : > { %v2560_v59 = vpop.f32.mrb[43].mxu0  ;;  %v3364_v45 = vmul.f32 -1.442695, %v2562_v18 }
 0xd04   : > { %v3365_v23 = vmul.f32 -1.442695, %v2569_v43 }
 0xd06   : > { %4030 = vpow2.f32 %v3365_v23 }
 0xd10   : > { %v4031_v38 = vpop.eup %4030 }
 0xd11   : > { %v2573_v41 = vadd.f32 1.0, %v4031_v38 }
 0xd13   : > { %4032 = vrcp.f32 %v2573_v41 }
 0xd14   : > { %4034 = vpow2.f32 %v3364_v45 }
 0xd1d   : > { %v4033_v42 = vpop.eup %4032 }
 0xd1e   : > { %v2576_v44 = vmul.f32 %v4033_v42, %v5064_v28  ;;  %v4035_v55 = vpop.eup %4034 }
 0xd1f   : > { %v2566_v50 = vadd.f32 1.0, %v4035_v55 }
 0xd20   : > { %v2577_v31 = vpack.c.bf16 %v2576_v44, %v2576_v44 }
 0xd21   : > { %4036 = vrcp.f32 %v2566_v50 }
 0xd22   : > { %3656 = vmatmul.mubr.bf16.vlgmr.msra.gmra.mrb[32].mxu1 %v2577_v31 }
 0xd23   : > { %3675 = vmatprep.mubr.msk.bf16.mxu1 %vm4332_vm0, %v4331_v57 }
 0xd2b   : > { %v4037_v33 = vpop.eup %4036 }
 0xd2c   : > { %v2684_v46 = vsub.f32 1.0, %v4037_v33 }
 0xd2e   : > { %v2685_v1 = vmul.f32 %v2684_v46, %v5064_v28 }
 0xdf5   : > { %v2676_v58 = vpop.f32.mrb[32].mxu1 }
 0xdf6   : > { %v2682_v29 = vadd.f32 %v2676_v58, %v4809_v54  ;;  %v3657_v48 = vpop.f32.mrb[33].mxu1  ;;  %v3962_v54 = vld [vmem:[#allocation12] sm:$0xff]  }
 0xdf7   : > { %v2679_v10 = vpop.f32.mrb[34].mxu1  ;;  %3660 = vmatpush3.bf16.msra.mxu1 %v3962_v54 }
 0xdf8   : > { %4038 = vtanh.f32 %v2682_v29  ;;  %v3658_v20 = vpop.f32.mrb[35].mxu1  ;;  %3661 = vmatprep.subr.bf16.mxu1 %v4331_v57 }
 0xdfb   : > { %3662 = vmatpush3.bf16.msra.mxu1 %v3963_v47 }
 0xdfc   : > { %3663 = vmatprep.subr.bf16.mxu1 %v4331_v57 }
 0xdff   : > { %3664 = vmatpush3.bf16.msra.mxu1 %v3964_v53 }
 0xe00   : > { %3665 = vmatprep.subr.bf16.mxu1 %v4331_v57 }
 0xe02   : > { %v4039_v61 = vpop.eup %4038 }
 0xe03   : > { %v2686_v21 = vmul.f32 %v4039_v61, %v4037_v33  ;;  %3666 = vmatpush3.bf16.msra.mxu1 %v3965_v16 }
 0xe04   : > { %3667 = vmatprep.subr.bf16.mxu1 %v4331_v57 }
 0xe05   : > { %v2687_v0 = vadd.f32 %v2686_v21, %v2685_v1 }
 0xe07   : > { %v2699_v5 = vmul.f32 %v3824_v9, %v2687_v0  ;;  %v2707_v51 = vpack.c.bf16 %v2687_v0, %v2687_v0  ;;  %3668 = vmatpush3.bf16.msra.mxu1 %v3966_v49 }
 0xe08   : > { %3669 = vmatprep.subr.bf16.mxu1 %v4331_v57 }
 0xe09   : > { %3375 = vst [vmem:[%s4650_s29 + $0x30] sm:$0xff] %v2699_v5  ;;  %2837 = vmatmul.mubr.bf16.vlgmr.msra.gmra.mrb[44].mxu0 %v2707_v51 }
 0xe0b   : > { %3670 = vmatpush3.bf16.msra.mxu1 %v3967_v7 }
 0xe0c   : > { %3671 = vmatprep.subr.bf16.mxu1 %v4331_v57 }
 0xe0f   : > { %3672 = vmatpush3.bf16.msra.mxu1 %v3968_v8 }
 0xe10   : > { %3673 = vmatprep.subr.bf16.mxu1 %v4331_v57 }
 0xe13   : > { %3674 = vmatpush3.bf16.msra.mxu1 %v3969_v6 }
 0xedc   : > { %v2838_v22 = vpop.f32.mrb[44].mxu0 }
 0xedd   : > { %v2845_v24 = vadd.f32 %v2838_v22, %v4796_v60  ;;  %v2840_v27 = vpop.f32.mrb[45].mxu0 }
 0xede   : > { %v2852_v56 = vadd.f32 %v2840_v27, %v4798_v62  ;;  %v2842_v2 = vpop.f32.mrb[46].mxu0 }
 0xedf   : > { %v2843_v28 = vpop.f32.mrb[47].mxu0  ;;  %v3392_v57 = vmul.f32 -1.442695, %v2845_v24 }
 0xee0   : > { %v3393_v34 = vmul.f32 -1.442695, %v2852_v56 }
 0xee2   : > { %4040 = vpow2.f32 %v3393_v34 }
 0xeec   : > { %v4041_v37 = vpop.eup %4040 }
 0xeed   : > { %v2856_v3 = vadd.f32 1.0, %v4041_v37 }
 0xeef   : > { %4042 = vrcp.f32 %v2856_v3 }
 0xef0   : > { %4044 = vpow2.f32 %v3392_v57 }
 0xef9   : > { %v4043_v11 = vpop.eup %4042 }
 0xefa   : > { %v2859_v30 = vmul.f32 %v4043_v11, %v2687_v0  ;;  %v4045_v36 = vpop.eup %4044 }
 0xefb   : > { %v2849_v60 = vadd.f32 1.0, %v4045_v36 }
 0xefc   : > { %v2860_v12 = vpack.c.bf16 %v2859_v30, %v2859_v30 }
 0xefd   : > { %4046 = vrcp.f32 %v2849_v60 }
 0xefe   : > { %3676 = vmatmul.mubr.bf16.vlgmr.msra.gmra.mrb[36].mxu1 %v2860_v12 }
 0xf07   : > { %v4047_v13 = vpop.eup %4046 }
 0xf08   : > { %v2967_v15 = vsub.f32 1.0, %v4047_v13 }
 0xf0a   : > { %v2968_v26 = vmul.f32 %v2967_v15, %v2687_v0 }
 0xfd1   : > { %v2959_v40 = vpop.f32.mrb[36].mxu1 }
 0xfd2   : > { %v2965_v62 = vadd.f32 %v2959_v40, %v4813_v63  ;;  %v3677_v17 = vpop.f32.mrb[37].mxu1 }
 0xfd3   : > { %v2962_v19 = vpop.f32.mrb[38].mxu1 }
 0xfd4   : > { %4048 = vtanh.f32 %v2965_v62  ;;  %v3678_v25 = vpop.f32.mrb[39].mxu1 }
 0xfde   : > { %v4049_v4 = vpop.eup %4048 }
 0xfdf   : > { %v2969_v39 = vmul.f32 %v4049_v4, %v4047_v13 }
 0xfe1   : > { %v2970_v18 = vadd.f32 %v2969_v39, %v2968_v26 }
 0xfe3   : > { %2971 = vst [vmem:[#allocation2] sm:$0xff] %v2970_v18  ;;  %v2982_v63 = vmul.f32 %v3825_v32, %v2970_v18 }
 0xfe5   : > { %3403 = vst [vmem:[%s4650_s29 + $0x38] sm:$0xff] %v2982_v63 }
 0xfe6   : > { %4234 = shalt.err (!%p4231_p12)
}
 0xfe7   : > { %s4235_s29 = scalar_lea.hbm %s5125_s28, 1024  ;;  %s4239_s15 = scalar_lea.hbm %s5183_s6, 2048 }
 0xfe8   : > { %p4236_p1 = scmp.ne.s32.totalorder %s5125_s28, %s4235_s29  ;;  %p4240_p11 = scmp.lt.u32.totalorder %s5125_s28, %s5183_s6 }
 0xfe9   : > { %p4241_p7 = scmp.lt.u32.totalorder %s4239_s15, %s4235_s29  ;;  %p4243_p5 = scmp.lt.u32.totalorder %s4235_s29, %s5125_s28 }
 0xfea   : > { %p4237_p3 = pnand %p4236_p1, %p5206_p10 }
 0xfeb   : > { %p4242_p6 = por %p4241_p7, %p4240_p11 }
 0xfec   : > { %p4238_p0 = pneg %p4237_p3 }
 0xfed   : > { %p4244_p13 = por %p4243_p5, %p4242_p6 }
 0xfef   : > { %p4245_p2 = pnand %p4244_p13, %p4238_p0 }
 0xff1   : > { %4248 = shalt.err (!%p4245_p2)
}
 0xff2   : > { %s4334_s13 = smov 128   ;;  %s4335_s27 = smov 8  }
 0xff3   : > { %3701 = dma.vmem_to_hbm [thread:$0]  (%p5206_p10), %s5127_s10, 1024, %s5125_s28, %s2986_s14, %s4334_s13, %s4334_s13, %s4335_s27  }
 0xff4 PF: > { %s3015_s24 = sand.u32 1, %s4295_s21   ;;  %p5207_p4 = scmp.ne.s32.totalorder %s5200_s9, 0 }
 0xff5   : > { %p5208_p9 = scmp.ge.s32.totalorder %s4315_s26, 2  ;;  %s3016_s17 = scalar_lea.sflag [#allocation6], %s3015_s24 }
 0xff7   : > { %p3724_p8 = pnand %p5208_p9, %p5207_p4 }
 0xff9   : > { %4290 = dma.done.wait (!%p3724_p8), %s3016_s17, 1024  }
 0xffa   : > { %4292 = vsyncadd (!%p3724_p8), %s3016_s17, 4294966272  ;;  %s25_s26 = sadd.s32 1, %s4315_s26   ;;  %s5209_s21 = smov %s4299_s22 }
 0xffb   : > { %p22_p12 = scmp.ge.s32.totalorder %s25_s26, 4   ;;  %s5210_s22 = smov %s4303_s23 }
 0xffc   : > { %s5211_s23 = smov %s4573_s7  ;;  %s5212_s24 = smov %s4311_s25 }
 0xffd   : > { %s5213_s25 = smov %s5215_s20  ;;  %24 = sbr.rel (!%p22_p12) target bundleno = 9 (0x9), region = 128 }
0x1004   :  { %3021 = vsyncpa [#allocation5], 1 }
0x1005   :  { %3023 = vsyncpa [#allocation5 + $0x1], 1 }
0x1006   :  { %3024 = vsyncpa [#allocation8], 1 }
0x1007   :  { %3025 = vsyncpa [#allocation11], 1 }
0x1008   :  { %3026 = vsyncpa [#allocation14], 1 }
0x1009   :  { %3027 = vsyncpa [#allocation6], 1 }
0x100a   :  { %3029 = vsyncpa [#allocation6 + $0x1], 1 }

</bundles_post_ra>
